<compile_context>
chip_gen: v5e
topology: v5e:2x2
jax: 0.10.0
libtpu: 0.0.40
codegen_flags: <defaults>
</compile_context>

<pallas_src>
import functools

import jax
import jax.numpy as jnp
from jax import lax
from jax.experimental import pallas as pl
from jax.experimental.pallas import tpu as pltpu


# f32 parameter-blob row offsets (one 8-row sublane tile per entry).
_ROW_W1 = 0     # pro1 weight, rows [0, feats_in)
_ROW_B1 = 8     # pro1 bias
_ROW_B2 = 16    # pro2 bias
_ROW_BSUM = 24  # bih + bhh, gate order i|f|g|o
_ROW_B3 = 32    # pro3 bias
_ROW_B4 = 40    # pro4 bias
_F32_ROWS = 48


def _bf16_offsets(H, L):
  """Row offsets (start, nrows) of each weight in the packed bf16 blob."""
  offs = {
      "w2": (0, L),              # (L, L)  pro2, nonzero block [0:H, 0:H]
      "wih": (L, L),             # (L, L)  W_ih, nonzero rows [0:H)
      "whh": (2 * L, H),         # (H, L)  W_hh
      "w3": (2 * L + H, H),      # (H, L)  pro3, nonzero cols [0:H//2)
      "w4": (2 * L + 2 * H, L),  # (L, L)  pro4, nonzero block [0:H//2, 0:Fout)
  }
  return offs, 3 * L + 2 * H


def _lstm_model_kernel(
    x_ref,        # (T*N, Fin) f32   observation-masked input (rows = t*N + n)
    tar_ref,      # (P*N, L)   f32   ground truth, zero-padded rows/lanes
    pf32_ref,     # (48, L)    f32   packed pro1 weight + all biases
    wbf_ref,      # (3L+2H, L) bf16  packed MXU weights (zero-padded)
    traj_ref,     # out: (P*N, L) f32
    loss_ref,     # out: (1, 1)   f32
    xg_scr,       # scratch: (T*N, L) f32   fused input-side gate pre-acts
    hh_scr,       # scratch: (P*N, H) f32   hidden history (last P steps only)
    *, T, N, H, P, Fin, L, N_real):
  f32 = jnp.float32
  bf16 = jnp.bfloat16
  offs, _ = _bf16_offsets(H, L)

  def wrow(name):
    o, n = offs[name]
    return wbf_ref[o:o + n, :]

  def frow(r, n=1):
    return pf32_ref[r:r + n, :]

  # ---- hoisted encoder: pro1 as VPU FMAs (contraction dim Fin is tiny) ----
  x = x_ref[...]                                             # (T*N, Fin)
  e1 = x[:, 0:1] * frow(_ROW_W1) + frow(_ROW_B1)
  for f in range(1, Fin):
    e1 = e1 + x[:, f:f + 1] * frow(_ROW_W1 + f)
  e1 = jnp.maximum(e1, 0.0)                                  # (T*N, L), lanes >= H are 0

  # ---- pro2 + fused input-side gate pre-activations (one batched dot) -----
  enc = (jnp.dot(e1.astype(bf16), wrow("w2"), preferred_element_type=f32)
         + frow(_ROW_B2))                                    # (T*N, L)
  xg_scr[...] = (jnp.dot(enc.astype(bf16), wrow("wih"),
                         preferred_element_type=f32)
                 + frow(_ROW_BSUM))                          # (T*N, 4H), lane-dense store

  whh = wrow("whh")                                          # (H, 4H) bf16, loop-invariant

  # ---- serial recurrence: ONE fused (N,H)@(H,4H) MXU push per step --------
  def gate_step(t, h_bf, c):
    row = pl.multiple_of(t * N, N)
    gates = (xg_scr[pl.ds(row, N), :]
             + jnp.dot(h_bf, whh, preferred_element_type=f32))  # (N, 4H)
    sig = jax.nn.sigmoid(gates)                              # full-tile sigmoid
    i_g = sig[:, 0:H]
    f_g = sig[:, H:2 * H]
    o_g = sig[:, 3 * H:4 * H]
    g_g = jnp.tanh(gates[:, 2 * H:3 * H])
    c_new = f_g * c + i_g * g_g
    h_new = o_g * jnp.tanh(c_new)
    return h_new.astype(bf16), h_new, c_new

  def prefix_body(t, carry):                                 # no history store
    h_bf, c = carry
    h_bf, _, c = gate_step(t, h_bf, c)
    return h_bf, c

  def tail_body(t, carry):                                   # store last P steps
    h_bf, c = carry
    h_bf, h_f, c = gate_step(t, h_bf, c)
    hh_row = pl.multiple_of((t - (T - P)) * N, N)
    hh_scr[pl.ds(hh_row, N), :] = h_f
    return h_bf, c

  h0 = jnp.zeros((N, H), bf16)
  c0 = jnp.zeros((N, H), f32)
  carry = lax.fori_loop(0, T - P, prefix_body, (h0, c0), unroll=True)
  lax.fori_loop(T - P, T, tail_body, carry, unroll=True)

  # ---- batched decoder over the last P steps: pro3 -> pro4 ----------------
  h_tail = hh_scr[...].astype(bf16)                          # (P*N, H)
  h3 = (jnp.dot(h_tail, wrow("w3"), preferred_element_type=f32)
        + frow(_ROW_B3))                                     # (P*N, L)
  tra = (jnp.dot(h3.astype(bf16), wrow("w4"), preferred_element_type=f32)
         + frow(_ROW_B4))                                    # (P*N, L)
  traj_ref[...] = tra                                        # single lane-dense store

  # TODO(synk): Traj_loss is not defined in the reference source; using mean
  # Euclidean displacement error (ADE) between traj and tar_y.
  rows = lax.broadcasted_iota(jnp.int32, (P * N, 1), 0)
  lmask = ((rows % N) < N_real).astype(f32)                  # mask padded batch rows
  diff = tra - tar_ref[...]                                  # padded lanes are 0 on both
  dist = jnp.sqrt(jnp.sum(diff * diff, axis=-1, keepdims=True)) * lmask
  loss_ref[...] = jnp.sum(dist, axis=0, keepdims=True) / (P * N_real)


def init_params(key, feats_in, feats_out, feats_hidden):
  """Deterministic parameter init (PyTorch-style U(-1/sqrt(fan_in), ...))."""
  H = feats_hidden
  ks = jax.random.split(key, 8)

  def lin(k, fan_in, fan_out):
    bound = 1.0 / (fan_in ** 0.5)
    kw, kb = jax.random.split(k)
    w = jax.random.uniform(kw, (fan_in, fan_out), jnp.float32, -bound, bound)
    b = jax.random.uniform(kb, (1, fan_out), jnp.float32, -bound, bound)
    return w, b

  w1, b1 = lin(ks[0], feats_in, H)
  w2, b2 = lin(ks[1], H, H)
  w3, b3 = lin(ks[2], H, H // 2)
  w4, b4 = lin(ks[3], H // 2, feats_out)
  bound = 1.0 / (H ** 0.5)
  # Stored pre-transposed: (input, 4H), PyTorch gate order i, f, g, o.
  wih = jax.random.uniform(ks[4], (H, 4 * H), jnp.float32, -bound, bound)
  whh = jax.random.uniform(ks[5], (H, 4 * H), jnp.float32, -bound, bound)
  bih = jax.random.uniform(ks[6], (1, 4 * H), jnp.float32, -bound, bound)
  bhh = jax.random.uniform(ks[7], (1, 4 * H), jnp.float32, -bound, bound)
  return (w1, b1, w2, b2, wih, whh, bih, bhh, w3, b3, w4, b4)


def lstm_forward(x, params, *, obs_length, feats_in, feats_out, feats_hidden):
  """Replicates LSTM.forward(inputs=(x,), iftrain) -> (traj, traj_loss)."""
  T, N, _ = x.shape
  H = feats_hidden
  P = T - obs_length                # prediction horizon
  f32, bf16 = jnp.float32, jnp.bfloat16

  L = 4 * H                         # fused gate width == lane pad everywhere
  assert L % 128 == 0 and H % 16 == 0, "feats_hidden must be a multiple of 32"
  assert feats_in <= 8 and feats_out <= L and (H // 2) <= L

  (w1, b1, w2, b2, wih, whh, bih, bhh, w3, b3, w4, b4) = params

  N_pad = max(8, -(-N // 8) * 8)    # sublane-pad batch rows (f32 sublane = 8)

  batch = x[:, :, :feats_in]
  tar_y = x[obs_length:, :, :feats_out]
  # torch.cat([batch[:obs_length], zeros_like(batch)[obs_length:]])
  tmask = (jnp.arange(T) < obs_length).astype(x.dtype)[:, None, None]
  batch_in = batch * tmask

  batch_2d = jnp.pad(batch_in, ((0, 0), (0, N_pad - N), (0, 0)))
  batch_2d = batch_2d.reshape(T * N_pad, feats_in).astype(f32)
  tar_2d = jnp.pad(tar_y, ((0, 0), (0, N_pad - N), (0, L - feats_out)))
  tar_2d = tar_2d.reshape(P * N_pad, L).astype(f32)

  def put(blob, row, a):
    return blob.at[row:row + a.shape[0], :a.shape[1]].set(a.astype(f32))

  # f32 blob: pro1 weight + every bias, zero-padded to L lanes.
  pf32 = jnp.zeros((_F32_ROWS, L), f32)
  pf32 = put(pf32, _ROW_W1, w1)
  pf32 = put(pf32, _ROW_B1, b1)
  pf32 = put(pf32, _ROW_B2, b2)
  pf32 = put(pf32, _ROW_BSUM, bih + bhh)
  pf32 = put(pf32, _ROW_B3, b3)
  pf32 = put(pf32, _ROW_B4, b4)

  # bf16 blob: all MXU weights, zero-padded to L lanes, 16-row aligned slots.
  offs, bf_rows = _bf16_offsets(H, L)
  wbf = jnp.zeros((bf_rows, L), f32)
  wbf = put(wbf, offs["w2"][0], w2)
  wbf = put(wbf, offs["wih"][0], wih)
  wbf = put(wbf, offs["whh"][0], whh)
  wbf = put(wbf, offs["w3"][0], w3)
  wbf = put(wbf, offs["w4"][0], w4)
  wbf = wbf.astype(bf16)

  kernel = functools.partial(_lstm_model_kernel, T=T, N=N_pad, H=H, P=P,
                             Fin=feats_in, L=L, N_real=N)
  traj2d, loss = pl.pallas_call(
      kernel,
      out_shape=(jax.ShapeDtypeStruct((P * N_pad, L), f32),
                 jax.ShapeDtypeStruct((1, 1), f32)),
      in_specs=[pl.BlockSpec(memory_space=pltpu.MemorySpace.VMEM)] * 4,
      out_specs=(pl.BlockSpec(memory_space=pltpu.MemorySpace.VMEM),
                 pl.BlockSpec(memory_space=pltpu.MemorySpace.VMEM)),
      scratch_shapes=[
          pltpu.VMEM((T * N_pad, L), f32),   # fused input-side gate pre-acts
          pltpu.VMEM((P * N_pad, H), f32),   # hidden history, last P steps
      ],
  )(batch_2d, tar_2d, pf32, wbf)

  traj = traj2d.reshape(P, N_pad, L)[:, :N, :feats_out]
  return traj, loss[0, 0]


if __name__ == "__main__":
  # Small shapes consistent with the forward: total seq = 2 * obs_length so
  # that traj (last obs_length steps) aligns with tar_y (steps after obs).
  obs_length = 4
  seq_total = 2 * obs_length        # T = 8
  batch_n = 2                       # N (number of agents / batch)
  feats_in = 2
  feats_out = 2
  feats_hidden = 32

  key = jax.random.PRNGKey(0)
  kx, kp = jax.random.split(key)
  x = jax.random.normal(kx, (seq_total, batch_n, feats_in), jnp.float32)
  params = init_params(kp, feats_in, feats_out, feats_hidden)

  traj, loss = lstm_forward(
      x, params, obs_length=obs_length, feats_in=feats_in,
      feats_out=feats_out, feats_hidden=feats_hidden)
  traj = jax.block_until_ready(traj)
  loss = jax.block_until_ready(loss)

  assert traj.shape == (obs_length, batch_n, feats_out), traj.shape
  assert bool(jnp.all(jnp.isfinite(traj))) and bool(jnp.isfinite(loss))
  print("KERNEL_OK")
</pallas_src>

<mosaic_0001>
module attributes {stable_mosaic.version = 11 : i64} {
  func.func @_lstm_model_kernel(%arg0: memref<64x2xf32, #tpu.memory_space<vmem>>, %arg1: memref<32x128xf32, #tpu.memory_space<vmem>>, %arg2: memref<48x128xf32, #tpu.memory_space<vmem>>, %arg3: memref<448x128xbf16, #tpu.memory_space<vmem>>, %arg4: memref<32x128xf32, #tpu.memory_space<vmem>>, %arg5: memref<1x1xf32, #tpu.memory_space<vmem>>, %arg6: memref<64x128xf32, #tpu.memory_space<vmem>>, %arg7: memref<32x32xf32, #tpu.memory_space<vmem>>) attributes {dimension_semantics = [], scalar_prefetch = 0 : i64, scratch_operands = 2 : i64, tpu.core_type = #tpu.core_type<tc>} {
    %c0 = arith.constant 0 : index
    %c0_0 = arith.constant 0 : index
    %0 = vector.load %arg0[%c0, %c0_0] : memref<64x2xf32, #tpu.memory_space<vmem>>, vector<64x2xf32>
    %1 = vector.extract_strided_slice %0 {offsets = [0, 0], sizes = [64, 1], strides = [1, 1]} : vector<64x2xf32> to vector<64x1xf32>
    %c0_1 = arith.constant 0 : index
    %c0_2 = arith.constant 0 : index
    %2 = vector.load %arg2[%c0_1, %c0_2] : memref<48x128xf32, #tpu.memory_space<vmem>>, vector<1x128xf32>
    %3 = vector.broadcast %1 : vector<64x1xf32> to vector<64x128xf32>
    %4 = vector.broadcast %2 : vector<1x128xf32> to vector<64x128xf32>
    %5 = arith.mulf %3, %4 : vector<64x128xf32>
    %c8 = arith.constant 8 : index
    %c0_3 = arith.constant 0 : index
    %6 = vector.load %arg2[%c8, %c0_3] : memref<48x128xf32, #tpu.memory_space<vmem>>, vector<1x128xf32>
    %7 = vector.broadcast %6 : vector<1x128xf32> to vector<64x128xf32>
    %8 = arith.addf %5, %7 : vector<64x128xf32>
    %9 = vector.extract_strided_slice %0 {offsets = [0, 1], sizes = [64, 1], strides = [1, 1]} : vector<64x2xf32> to vector<64x1xf32>
    %c1 = arith.constant 1 : index
    %c0_4 = arith.constant 0 : index
    %10 = vector.load %arg2[%c1, %c0_4] : memref<48x128xf32, #tpu.memory_space<vmem>>, vector<1x128xf32>
    %11 = vector.broadcast %9 : vector<64x1xf32> to vector<64x128xf32>
    %12 = vector.broadcast %10 : vector<1x128xf32> to vector<64x128xf32>
    %13 = arith.mulf %11, %12 : vector<64x128xf32>
    %14 = arith.addf %8, %13 : vector<64x128xf32>
    %cst = arith.constant 0.000000e+00 : f32
    %15 = vector.broadcast %cst : f32 to vector<64x128xf32>
    %16 = arith.maximumf %14, %15 : vector<64x128xf32>
    %17 = arith.truncf %16 : vector<64x128xf32> to vector<64x128xbf16>
    %c0_5 = arith.constant 0 : index
    %c0_6 = arith.constant 0 : index
    %18 = vector.load %arg3[%c0_5, %c0_6] : memref<448x128xbf16, #tpu.memory_space<vmem>>, vector<128x128xbf16>
    %cst_7 = arith.constant dense<0.000000e+00> : vector<64x128xf32>
    %19 = tpu.matmul %17, %18, %cst_7 {dimension_numbers = #tpu.dot_dimension_numbers<[1], [0], [0], [1], [0, 0, 1, 1], [], []>} : vector<64x128xbf16>, vector<128x128xbf16>, vector<64x128xf32> -> vector<64x128xf32>
    %c16 = arith.constant 16 : index
    %c0_8 = arith.constant 0 : index
    %20 = vector.load %arg2[%c16, %c0_8] : memref<48x128xf32, #tpu.memory_space<vmem>>, vector<1x128xf32>
    %21 = vector.broadcast %20 : vector<1x128xf32> to vector<64x128xf32>
    %22 = arith.addf %19, %21 : vector<64x128xf32>
    %23 = arith.truncf %22 : vector<64x128xf32> to vector<64x128xbf16>
    %c128 = arith.constant 128 : index
    %c0_9 = arith.constant 0 : index
    %24 = vector.load %arg3[%c128, %c0_9] : memref<448x128xbf16, #tpu.memory_space<vmem>>, vector<128x128xbf16>
    %cst_10 = arith.constant dense<0.000000e+00> : vector<64x128xf32>
    %25 = tpu.matmul %23, %24, %cst_10 {dimension_numbers = #tpu.dot_dimension_numbers<[1], [0], [0], [1], [0, 0, 1, 1], [], []>} : vector<64x128xbf16>, vector<128x128xbf16>, vector<64x128xf32> -> vector<64x128xf32>
    %c24 = arith.constant 24 : index
    %c0_11 = arith.constant 0 : index
    %26 = vector.load %arg2[%c24, %c0_11] : memref<48x128xf32, #tpu.memory_space<vmem>>, vector<1x128xf32>
    %27 = vector.broadcast %26 : vector<1x128xf32> to vector<64x128xf32>
    %28 = arith.addf %25, %27 : vector<64x128xf32>
    %c0_12 = arith.constant 0 : index
    %c0_13 = arith.constant 0 : index
    %29 = vector.load %arg6[%c0_12, %c0_13] : memref<64x128xf32, #tpu.memory_space<vmem>>, vector<64x128xf32>
    tpu.vector_store %arg6[%c0_12, %c0_13], %28 {strides = array<i32>} : memref<64x128xf32, #tpu.memory_space<vmem>>, vector<64x128xf32>,
    %c256 = arith.constant 256 : index
    %c0_14 = arith.constant 0 : index
    %30 = vector.load %arg3[%c256, %c0_14] : memref<448x128xbf16, #tpu.memory_space<vmem>>, vector<32x128xbf16>
    %cst_15 = arith.constant 0.000000e+00 : bf16
    %31 = vector.broadcast %cst_15 : bf16 to vector<8x32xbf16>
    %cst_16 = arith.constant 0.000000e+00 : f32
    %32 = vector.broadcast %cst_16 : f32 to vector<8x32xf32>
    %c0_i32 = arith.constant 0 : i32
    %c8_i32 = arith.constant 8 : i32
    %33 = arith.muli %c0_i32, %c8_i32 : i32
    %34 = tpu.assume_multiple %33, 8 : i32
    %35 = arith.index_cast %34 : i32 to index
    %c0_17 = arith.constant 0 : index
    %36 = vector.load %arg6[%35, %c0_17] : memref<64x128xf32, #tpu.memory_space<vmem>>, vector<8x128xf32>
    %cst_18 = arith.constant dense<0.000000e+00> : vector<8x128xf32>
    %37 = tpu.matmul %31, %30, %cst_18 {dimension_numbers = #tpu.dot_dimension_numbers<[1], [0], [0], [1], [0, 0, 1, 1], [], []>} : vector<8x32xbf16>, vector<32x128xbf16>, vector<8x128xf32> -> vector<8x128xf32>
    %38 = arith.addf %36, %37 : vector<8x128xf32>
    %39 = arith.negf %38 : vector<8x128xf32>
    %40 = math.exp %39 : vector<8x128xf32>
    %cst_19 = arith.constant 1.000000e+00 : f32
    %41 = vector.broadcast %cst_19 : f32 to vector<8x128xf32>
    %42 = arith.addf %41, %40 : vector<8x128xf32>
    %43 = arith.divf %41, %42 : vector<8x128xf32>
    %44 = vector.extract_strided_slice %43 {offsets = [0, 0], sizes = [8, 32], strides = [1, 1]} : vector<8x128xf32> to vector<8x32xf32>
    %45 = vector.extract_strided_slice %43 {offsets = [0, 32], sizes = [8, 32], strides = [1, 1]} : vector<8x128xf32> to vector<8x32xf32>
    %46 = vector.extract_strided_slice %43 {offsets = [0, 96], sizes = [8, 32], strides = [1, 1]} : vector<8x128xf32> to vector<8x32xf32>
    %47 = vector.extract_strided_slice %38 {offsets = [0, 64], sizes = [8, 32], strides = [1, 1]} : vector<8x128xf32> to vector<8x32xf32>
    %48 = math.tanh %47 : vector<8x32xf32>
    %49 = arith.mulf %45, %32 : vector<8x32xf32>
    %50 = arith.mulf %44, %48 : vector<8x32xf32>
    %51 = arith.addf %49, %50 : vector<8x32xf32>
    %52 = math.tanh %51 : vector<8x32xf32>
    %53 = arith.mulf %46, %52 : vector<8x32xf32>
    %54 = arith.truncf %53 : vector<8x32xf32> to vector<8x32xbf16>
    %c1_i32 = arith.constant 1 : i32
    %c8_i32_20 = arith.constant 8 : i32
    %55 = arith.muli %c1_i32, %c8_i32_20 : i32
    %56 = tpu.assume_multiple %55, 8 : i32
    %57 = arith.index_cast %56 : i32 to index
    %c0_21 = arith.constant 0 : index
    %58 = vector.load %arg6[%57, %c0_21] : memref<64x128xf32, #tpu.memory_space<vmem>>, vector<8x128xf32>
    %cst_22 = arith.constant dense<0.000000e+00> : vector<8x128xf32>
    %59 = tpu.matmul %54, %30, %cst_22 {dimension_numbers = #tpu.dot_dimension_numbers<[1], [0], [0], [1], [0, 0, 1, 1], [], []>} : vector<8x32xbf16>, vector<32x128xbf16>, vector<8x128xf32> -> vector<8x128xf32>
    %60 = arith.addf %58, %59 : vector<8x128xf32>
    %61 = arith.negf %60 : vector<8x128xf32>
    %62 = math.exp %61 : vector<8x128xf32>
    %cst_23 = arith.constant 1.000000e+00 : f32
    %63 = vector.broadcast %cst_23 : f32 to vector<8x128xf32>
    %64 = arith.addf %63, %62 : vector<8x128xf32>
    %65 = arith.divf %63, %64 : vector<8x128xf32>
    %66 = vector.extract_strided_slice %65 {offsets = [0, 0], sizes = [8, 32], strides = [1, 1]} : vector<8x128xf32> to vector<8x32xf32>
    %67 = vector.extract_strided_slice %65 {offsets = [0, 32], sizes = [8, 32], strides = [1, 1]} : vector<8x128xf32> to vector<8x32xf32>
    %68 = vector.extract_strided_slice %65 {offsets = [0, 96], sizes = [8, 32], strides = [1, 1]} : vector<8x128xf32> to vector<8x32xf32>
    %69 = vector.extract_strided_slice %60 {offsets = [0, 64], sizes = [8, 32], strides = [1, 1]} : vector<8x128xf32> to vector<8x32xf32>
    %70 = math.tanh %69 : vector<8x32xf32>
    %71 = arith.mulf %67, %51 : vector<8x32xf32>
    %72 = arith.mulf %66, %70 : vector<8x32xf32>
    %73 = arith.addf %71, %72 : vector<8x32xf32>
    %74 = math.tanh %73 : vector<8x32xf32>
    %75 = arith.mulf %68, %74 : vector<8x32xf32>
    %76 = arith.truncf %75 : vector<8x32xf32> to vector<8x32xbf16>
    %c2_i32 = arith.constant 2 : i32
    %c8_i32_24 = arith.constant 8 : i32
    %77 = arith.muli %c2_i32, %c8_i32_24 : i32
    %78 = tpu.assume_multiple %77, 8 : i32
    %79 = arith.index_cast %78 : i32 to index
    %c0_25 = arith.constant 0 : index
    %80 = vector.load %arg6[%79, %c0_25] : memref<64x128xf32, #tpu.memory_space<vmem>>, vector<8x128xf32>
    %cst_26 = arith.constant dense<0.000000e+00> : vector<8x128xf32>
    %81 = tpu.matmul %76, %30, %cst_26 {dimension_numbers = #tpu.dot_dimension_numbers<[1], [0], [0], [1], [0, 0, 1, 1], [], []>} : vector<8x32xbf16>, vector<32x128xbf16>, vector<8x128xf32> -> vector<8x128xf32>
    %82 = arith.addf %80, %81 : vector<8x128xf32>
    %83 = arith.negf %82 : vector<8x128xf32>
    %84 = math.exp %83 : vector<8x128xf32>
    %cst_27 = arith.constant 1.000000e+00 : f32
    %85 = vector.broadcast %cst_27 : f32 to vector<8x128xf32>
    %86 = arith.addf %85, %84 : vector<8x128xf32>
    %87 = arith.divf %85, %86 : vector<8x128xf32>
    %88 = vector.extract_strided_slice %87 {offsets = [0, 0], sizes = [8, 32], strides = [1, 1]} : vector<8x128xf32> to vector<8x32xf32>
    %89 = vector.extract_strided_slice %87 {offsets = [0, 32], sizes = [8, 32], strides = [1, 1]} : vector<8x128xf32> to vector<8x32xf32>
    %90 = vector.extract_strided_slice %87 {offsets = [0, 96], sizes = [8, 32], strides = [1, 1]} : vector<8x128xf32> to vector<8x32xf32>
    %91 = vector.extract_strided_slice %82 {offsets = [0, 64], sizes = [8, 32], strides = [1, 1]} : vector<8x128xf32> to vector<8x32xf32>
    %92 = math.tanh %91 : vector<8x32xf32>
    %93 = arith.mulf %89, %73 : vector<8x32xf32>
    %94 = arith.mulf %88, %92 : vector<8x32xf32>
    %95 = arith.addf %93, %94 : vector<8x32xf32>
    %96 = math.tanh %95 : vector<8x32xf32>
    %97 = arith.mulf %90, %96 : vector<8x32xf32>
    %98 = arith.truncf %97 : vector<8x32xf32> to vector<8x32xbf16>
    %c3_i32 = arith.constant 3 : i32
    %c8_i32_28 = arith.constant 8 : i32
    %99 = arith.muli %c3_i32, %c8_i32_28 : i32
    %100 = tpu.assume_multiple %99, 8 : i32
    %101 = arith.index_cast %100 : i32 to index
    %c0_29 = arith.constant 0 : index
    %102 = vector.load %arg6[%101, %c0_29] : memref<64x128xf32, #tpu.memory_space<vmem>>, vector<8x128xf32>
    %cst_30 = arith.constant dense<0.000000e+00> : vector<8x128xf32>
    %103 = tpu.matmul %98, %30, %cst_30 {dimension_numbers = #tpu.dot_dimension_numbers<[1], [0], [0], [1], [0, 0, 1, 1], [], []>} : vector<8x32xbf16>, vector<32x128xbf16>, vector<8x128xf32> -> vector<8x128xf32>
    %104 = arith.addf %102, %103 : vector<8x128xf32>
    %105 = arith.negf %104 : vector<8x128xf32>
    %106 = math.exp %105 : vector<8x128xf32>
    %cst_31 = arith.constant 1.000000e+00 : f32
    %107 = vector.broadcast %cst_31 : f32 to vector<8x128xf32>
    %108 = arith.addf %107, %106 : vector<8x128xf32>
    %109 = arith.divf %107, %108 : vector<8x128xf32>
    %110 = vector.extract_strided_slice %109 {offsets = [0, 0], sizes = [8, 32], strides = [1, 1]} : vector<8x128xf32> to vector<8x32xf32>
    %111 = vector.extract_strided_slice %109 {offsets = [0, 32], sizes = [8, 32], strides = [1, 1]} : vector<8x128xf32> to vector<8x32xf32>
    %112 = vector.extract_strided_slice %109 {offsets = [0, 96], sizes = [8, 32], strides = [1, 1]} : vector<8x128xf32> to vector<8x32xf32>
    %113 = vector.extract_strided_slice %104 {offsets = [0, 64], sizes = [8, 32], strides = [1, 1]} : vector<8x128xf32> to vector<8x32xf32>
    %114 = math.tanh %113 : vector<8x32xf32>
    %115 = arith.mulf %111, %95 : vector<8x32xf32>
    %116 = arith.mulf %110, %114 : vector<8x32xf32>
    %117 = arith.addf %115, %116 : vector<8x32xf32>
    %118 = math.tanh %117 : vector<8x32xf32>
    %119 = arith.mulf %112, %118 : vector<8x32xf32>
    %120 = arith.truncf %119 : vector<8x32xf32> to vector<8x32xbf16>
    %c4_i32 = arith.constant 4 : i32
    %c4_i32_32 = arith.constant 4 : i32
    %c8_i32_33 = arith.constant 8 : i32
    %121 = arith.muli %c4_i32_32, %c8_i32_33 : i32
    %122 = tpu.assume_multiple %121, 8 : i32
    %123 = arith.index_cast %122 : i32 to index
    %c0_34 = arith.constant 0 : index
    %124 = vector.load %arg6[%123, %c0_34] : memref<64x128xf32, #tpu.memory_space<vmem>>, vector<8x128xf32>
    %cst_35 = arith.constant dense<0.000000e+00> : vector<8x128xf32>
    %125 = tpu.matmul %120, %30, %cst_35 {dimension_numbers = #tpu.dot_dimension_numbers<[1], [0], [0], [1], [0, 0, 1, 1], [], []>} : vector<8x32xbf16>, vector<32x128xbf16>, vector<8x128xf32> -> vector<8x128xf32>
    %126 = arith.addf %124, %125 : vector<8x128xf32>
    %127 = arith.negf %126 : vector<8x128xf32>
    %128 = math.exp %127 : vector<8x128xf32>
    %cst_36 = arith.constant 1.000000e+00 : f32
    %129 = vector.broadcast %cst_36 : f32 to vector<8x128xf32>
    %130 = arith.addf %129, %128 : vector<8x128xf32>
    %131 = arith.divf %129, %130 : vector<8x128xf32>
    %132 = vector.extract_strided_slice %131 {offsets = [0, 0], sizes = [8, 32], strides = [1, 1]} : vector<8x128xf32> to vector<8x32xf32>
    %133 = vector.extract_strided_slice %131 {offsets = [0, 32], sizes = [8, 32], strides = [1, 1]} : vector<8x128xf32> to vector<8x32xf32>
    %134 = vector.extract_strided_slice %131 {offsets = [0, 96], sizes = [8, 32], strides = [1, 1]} : vector<8x128xf32> to vector<8x32xf32>
    %135 = vector.extract_strided_slice %126 {offsets = [0, 64], sizes = [8, 32], strides = [1, 1]} : vector<8x128xf32> to vector<8x32xf32>
    %136 = math.tanh %135 : vector<8x32xf32>
    %137 = arith.mulf %133, %117 : vector<8x32xf32>
    %138 = arith.mulf %132, %136 : vector<8x32xf32>
    %139 = arith.addf %137, %138 : vector<8x32xf32>
    %140 = math.tanh %139 : vector<8x32xf32>
    %141 = arith.mulf %134, %140 : vector<8x32xf32>
    %142 = arith.truncf %141 : vector<8x32xf32> to vector<8x32xbf16>
    %c4_i32_37 = arith.constant 4 : i32
    %143 = arith.subi %c4_i32_32, %c4_i32_37 : i32
    %c8_i32_38 = arith.constant 8 : i32
    %144 = arith.muli %143, %c8_i32_38 : i32
    %145 = tpu.assume_multiple %144, 8 : i32
    %146 = arith.index_cast %145 : i32 to index
    %c0_39 = arith.constant 0 : index
    %147 = vector.load %arg7[%146, %c0_39] : memref<32x32xf32, #tpu.memory_space<vmem>>, vector<8x32xf32>
    tpu.vector_store %arg7[%146, %c0_39], %141 {strides = array<i32>} : memref<32x32xf32, #tpu.memory_space<vmem>>, vector<8x32xf32>,
    %c5_i32 = arith.constant 5 : i32
    %c8_i32_40 = arith.constant 8 : i32
    %148 = arith.muli %c5_i32, %c8_i32_40 : i32
    %149 = tpu.assume_multiple %148, 8 : i32
    %150 = arith.index_cast %149 : i32 to index
    %c0_41 = arith.constant 0 : index
    %151 = vector.load %arg6[%150, %c0_41] : memref<64x128xf32, #tpu.memory_space<vmem>>, vector<8x128xf32>
    %cst_42 = arith.constant dense<0.000000e+00> : vector<8x128xf32>
    %152 = tpu.matmul %142, %30, %cst_42 {dimension_numbers = #tpu.dot_dimension_numbers<[1], [0], [0], [1], [0, 0, 1, 1], [], []>} : vector<8x32xbf16>, vector<32x128xbf16>, vector<8x128xf32> -> vector<8x128xf32>
    %153 = arith.addf %151, %152 : vector<8x128xf32>
    %154 = arith.negf %153 : vector<8x128xf32>
    %155 = math.exp %154 : vector<8x128xf32>
    %cst_43 = arith.constant 1.000000e+00 : f32
    %156 = vector.broadcast %cst_43 : f32 to vector<8x128xf32>
    %157 = arith.addf %156, %155 : vector<8x128xf32>
    %158 = arith.divf %156, %157 : vector<8x128xf32>
    %159 = vector.extract_strided_slice %158 {offsets = [0, 0], sizes = [8, 32], strides = [1, 1]} : vector<8x128xf32> to vector<8x32xf32>
    %160 = vector.extract_strided_slice %158 {offsets = [0, 32], sizes = [8, 32], strides = [1, 1]} : vector<8x128xf32> to vector<8x32xf32>
    %161 = vector.extract_strided_slice %158 {offsets = [0, 96], sizes = [8, 32], strides = [1, 1]} : vector<8x128xf32> to vector<8x32xf32>
    %162 = vector.extract_strided_slice %153 {offsets = [0, 64], sizes = [8, 32], strides = [1, 1]} : vector<8x128xf32> to vector<8x32xf32>
    %163 = math.tanh %162 : vector<8x32xf32>
    %164 = arith.mulf %160, %139 : vector<8x32xf32>
    %165 = arith.mulf %159, %163 : vector<8x32xf32>
    %166 = arith.addf %164, %165 : vector<8x32xf32>
    %167 = math.tanh %166 : vector<8x32xf32>
    %168 = arith.mulf %161, %167 : vector<8x32xf32>
    %169 = arith.truncf %168 : vector<8x32xf32> to vector<8x32xbf16>
    %c4_i32_44 = arith.constant 4 : i32
    %170 = arith.subi %c5_i32, %c4_i32_44 : i32
    %c8_i32_45 = arith.constant 8 : i32
    %171 = arith.muli %170, %c8_i32_45 : i32
    %172 = tpu.assume_multiple %171, 8 : i32
    %173 = arith.index_cast %172 : i32 to index
    %c0_46 = arith.constant 0 : index
    %174 = vector.load %arg7[%173, %c0_46] : memref<32x32xf32, #tpu.memory_space<vmem>>, vector<8x32xf32>
    tpu.vector_store %arg7[%173, %c0_46], %168 {strides = array<i32>} : memref<32x32xf32, #tpu.memory_space<vmem>>, vector<8x32xf32>,
    %c6_i32 = arith.constant 6 : i32
    %c8_i32_47 = arith.constant 8 : i32
    %175 = arith.muli %c6_i32, %c8_i32_47 : i32
    %176 = tpu.assume_multiple %175, 8 : i32
    %177 = arith.index_cast %176 : i32 to index
    %c0_48 = arith.constant 0 : index
    %178 = vector.load %arg6[%177, %c0_48] : memref<64x128xf32, #tpu.memory_space<vmem>>, vector<8x128xf32>
    %cst_49 = arith.constant dense<0.000000e+00> : vector<8x128xf32>
    %179 = tpu.matmul %169, %30, %cst_49 {dimension_numbers = #tpu.dot_dimension_numbers<[1], [0], [0], [1], [0, 0, 1, 1], [], []>} : vector<8x32xbf16>, vector<32x128xbf16>, vector<8x128xf32> -> vector<8x128xf32>
    %180 = arith.addf %178, %179 : vector<8x128xf32>
    %181 = arith.negf %180 : vector<8x128xf32>
    %182 = math.exp %181 : vector<8x128xf32>
    %cst_50 = arith.constant 1.000000e+00 : f32
    %183 = vector.broadcast %cst_50 : f32 to vector<8x128xf32>
    %184 = arith.addf %183, %182 : vector<8x128xf32>
    %185 = arith.divf %183, %184 : vector<8x128xf32>
    %186 = vector.extract_strided_slice %185 {offsets = [0, 0], sizes = [8, 32], strides = [1, 1]} : vector<8x128xf32> to vector<8x32xf32>
    %187 = vector.extract_strided_slice %185 {offsets = [0, 32], sizes = [8, 32], strides = [1, 1]} : vector<8x128xf32> to vector<8x32xf32>
    %188 = vector.extract_strided_slice %185 {offsets = [0, 96], sizes = [8, 32], strides = [1, 1]} : vector<8x128xf32> to vector<8x32xf32>
    %189 = vector.extract_strided_slice %180 {offsets = [0, 64], sizes = [8, 32], strides = [1, 1]} : vector<8x128xf32> to vector<8x32xf32>
    %190 = math.tanh %189 : vector<8x32xf32>
    %191 = arith.mulf %187, %166 : vector<8x32xf32>
    %192 = arith.mulf %186, %190 : vector<8x32xf32>
    %193 = arith.addf %191, %192 : vector<8x32xf32>
    %194 = math.tanh %193 : vector<8x32xf32>
    %195 = arith.mulf %188, %194 : vector<8x32xf32>
    %196 = arith.truncf %195 : vector<8x32xf32> to vector<8x32xbf16>
    %c4_i32_51 = arith.constant 4 : i32
    %197 = arith.subi %c6_i32, %c4_i32_51 : i32
    %c8_i32_52 = arith.constant 8 : i32
    %198 = arith.muli %197, %c8_i32_52 : i32
    %199 = tpu.assume_multiple %198, 8 : i32
    %200 = arith.index_cast %199 : i32 to index
    %c0_53 = arith.constant 0 : index
    %201 = vector.load %arg7[%200, %c0_53] : memref<32x32xf32, #tpu.memory_space<vmem>>, vector<8x32xf32>
    tpu.vector_store %arg7[%200, %c0_53], %195 {strides = array<i32>} : memref<32x32xf32, #tpu.memory_space<vmem>>, vector<8x32xf32>,
    %c7_i32 = arith.constant 7 : i32
    %c8_i32_54 = arith.constant 8 : i32
    %202 = arith.muli %c7_i32, %c8_i32_54 : i32
    %203 = tpu.assume_multiple %202, 8 : i32
    %204 = arith.index_cast %203 : i32 to index
    %c0_55 = arith.constant 0 : index
    %205 = vector.load %arg6[%204, %c0_55] : memref<64x128xf32, #tpu.memory_space<vmem>>, vector<8x128xf32>
    %cst_56 = arith.constant dense<0.000000e+00> : vector<8x128xf32>
    %206 = tpu.matmul %196, %30, %cst_56 {dimension_numbers = #tpu.dot_dimension_numbers<[1], [0], [0], [1], [0, 0, 1, 1], [], []>} : vector<8x32xbf16>, vector<32x128xbf16>, vector<8x128xf32> -> vector<8x128xf32>
    %207 = arith.addf %205, %206 : vector<8x128xf32>
    %208 = arith.negf %207 : vector<8x128xf32>
    %209 = math.exp %208 : vector<8x128xf32>
    %cst_57 = arith.constant 1.000000e+00 : f32
    %210 = vector.broadcast %cst_57 : f32 to vector<8x128xf32>
    %211 = arith.addf %210, %209 : vector<8x128xf32>
    %212 = arith.divf %210, %211 : vector<8x128xf32>
    %213 = vector.extract_strided_slice %212 {offsets = [0, 0], sizes = [8, 32], strides = [1, 1]} : vector<8x128xf32> to vector<8x32xf32>
    %214 = vector.extract_strided_slice %212 {offsets = [0, 32], sizes = [8, 32], strides = [1, 1]} : vector<8x128xf32> to vector<8x32xf32>
    %215 = vector.extract_strided_slice %212 {offsets = [0, 96], sizes = [8, 32], strides = [1, 1]} : vector<8x128xf32> to vector<8x32xf32>
    %216 = vector.extract_strided_slice %207 {offsets = [0, 64], sizes = [8, 32], strides = [1, 1]} : vector<8x128xf32> to vector<8x32xf32>
    %217 = math.tanh %216 : vector<8x32xf32>
    %218 = arith.mulf %214, %193 : vector<8x32xf32>
    %219 = arith.mulf %213, %217 : vector<8x32xf32>
    %220 = arith.addf %218, %219 : vector<8x32xf32>
    %221 = math.tanh %220 : vector<8x32xf32>
    %222 = arith.mulf %215, %221 : vector<8x32xf32>
    %223 = arith.truncf %222 : vector<8x32xf32> to vector<8x32xbf16>
    %c4_i32_58 = arith.constant 4 : i32
    %224 = arith.subi %c7_i32, %c4_i32_58 : i32
    %c8_i32_59 = arith.constant 8 : i32
    %225 = arith.muli %224, %c8_i32_59 : i32
    %226 = tpu.assume_multiple %225, 8 : i32
    %227 = arith.index_cast %226 : i32 to index
    %c0_60 = arith.constant 0 : index
    %228 = vector.load %arg7[%227, %c0_60] : memref<32x32xf32, #tpu.memory_space<vmem>>, vector<8x32xf32>
    tpu.vector_store %arg7[%227, %c0_60], %222 {strides = array<i32>} : memref<32x32xf32, #tpu.memory_space<vmem>>, vector<8x32xf32>,
    %c4_i32_61 = arith.constant 4 : i32
    %c0_62 = arith.constant 0 : index
    %c0_63 = arith.constant 0 : index
    %229 = vector.load %arg7[%c0_62, %c0_63] : memref<32x32xf32, #tpu.memory_space<vmem>>, vector<32x32xf32>
    %230 = arith.truncf %229 : vector<32x32xf32> to vector<32x32xbf16>
    %c288 = arith.constant 288 : index
    %c0_64 = arith.constant 0 : index
    %231 = vector.load %arg3[%c288, %c0_64] : memref<448x128xbf16, #tpu.memory_space<vmem>>, vector<32x128xbf16>
    %cst_65 = arith.constant dense<0.000000e+00> : vector<32x128xf32>
    %232 = tpu.matmul %230, %231, %cst_65 {dimension_numbers = #tpu.dot_dimension_numbers<[1], [0], [0], [1], [0, 0, 1, 1], [], []>} : vector<32x32xbf16>, vector<32x128xbf16>, vector<32x128xf32> -> vector<32x128xf32>
    %c32 = arith.constant 32 : index
    %c0_66 = arith.constant 0 : index
    %233 = vector.load %arg2[%c32, %c0_66] : memref<48x128xf32, #tpu.memory_space<vmem>>, vector<1x128xf32>
    %234 = vector.broadcast %233 : vector<1x128xf32> to vector<32x128xf32>
    %235 = arith.addf %232, %234 : vector<32x128xf32>
    %236 = arith.truncf %235 : vector<32x128xf32> to vector<32x128xbf16>
    %c320 = arith.constant 320 : index
    %c0_67 = arith.constant 0 : index
    %237 = vector.load %arg3[%c320, %c0_67] : memref<448x128xbf16, #tpu.memory_space<vmem>>, vector<128x128xbf16>
    %cst_68 = arith.constant dense<0.000000e+00> : vector<32x128xf32>
    %238 = tpu.matmul %236, %237, %cst_68 {dimension_numbers = #tpu.dot_dimension_numbers<[1], [0], [0], [1], [0, 0, 1, 1], [], []>} : vector<32x128xbf16>, vector<128x128xbf16>, vector<32x128xf32> -> vector<32x128xf32>
    %c40 = arith.constant 40 : index
    %c0_69 = arith.constant 0 : index
    %239 = vector.load %arg2[%c40, %c0_69] : memref<48x128xf32, #tpu.memory_space<vmem>>, vector<1x128xf32>
    %240 = vector.broadcast %239 : vector<1x128xf32> to vector<32x128xf32>
    %241 = arith.addf %238, %240 : vector<32x128xf32>
    %c0_70 = arith.constant 0 : index
    %c0_71 = arith.constant 0 : index
    %242 = vector.load %arg4[%c0_70, %c0_71] : memref<32x128xf32, #tpu.memory_space<vmem>>, vector<32x128xf32>
    tpu.vector_store %arg4[%c0_70, %c0_71], %241 {strides = array<i32>} : memref<32x128xf32, #tpu.memory_space<vmem>>, vector<32x128xf32>,
    %243 = tpu.iota {dimensions = array<i32: 0>} : vector<32x1xi32>
    %c8_i32_72 = arith.constant 8 : i32
    %c0_i32_73 = arith.constant 0 : i32
    %244 = arith.cmpi eq, %c8_i32_72, %c0_i32_73 : i32
    %c1_i32_74 = arith.constant 1 : i32
    %245 = arith.select %244, %c1_i32_74, %c8_i32_72 : i32
    %246 = vector.broadcast %245 : i32 to vector<32x1xi32>
    %247 = arith.remsi %243, %246 : vector<32x1xi32>
    %c0_i32_75 = arith.constant 0 : i32
    %248 = vector.broadcast %c0_i32_75 : i32 to vector<32x1xi32>
    %249 = arith.cmpi ne, %247, %248 : vector<32x1xi32>
    %c0_i32_76 = arith.constant 0 : i32
    %250 = vector.broadcast %c0_i32_76 : i32 to vector<32x1xi32>
    %251 = arith.cmpi slt, %247, %250 : vector<32x1xi32>
    %c0_i32_77 = arith.constant 0 : i32
    %252 = arith.cmpi slt, %245, %c0_i32_77 : i32
    %253 = vector.broadcast %252 : i1 to vector<32x1xi1>
    %254 = vector.broadcast %253 : vector<32x1xi1> to vector<32x1xi1>
    %255 = arith.xori %251, %254 : vector<32x1xi1>
    %256 = arith.andi %255, %249 : vector<32x1xi1>
    %257 = vector.broadcast %245 : i32 to vector<32x1xi32>
    %258 = arith.addi %247, %257 : vector<32x1xi32>
    %259 = arith.select %256, %258, %247 : vector<32x1xi1>, vector<32x1xi32>
    %c2_i32_78 = arith.constant 2 : i32
    %260 = vector.broadcast %c2_i32_78 : i32 to vector<32x1xi32>
    %261 = arith.cmpi slt, %259, %260 : vector<32x1xi32>
    %262 = arith.extui %261 : vector<32x1xi1> to vector<32x1xi32>
    %263 = arith.sitofp %262 : vector<32x1xi32> to vector<32x1xf32>
    %c0_79 = arith.constant 0 : index
    %c0_80 = arith.constant 0 : index
    %264 = vector.load %arg1[%c0_79, %c0_80] : memref<32x128xf32, #tpu.memory_space<vmem>>, vector<32x128xf32>
    %265 = arith.subf %241, %264 : vector<32x128xf32>
    %266 = arith.mulf %265, %265 : vector<32x128xf32>
    %cst_81 = arith.constant dense<0.000000e+00> : vector<32xf32>
    %267 = vector.multi_reduction <add>, %266, %cst_81 [1] : vector<32x128xf32> to vector<32xf32>
    %268 = vector.shape_cast %267 : vector<32xf32> to vector<32x1xf32>
    %269 = math.sqrt %268 : vector<32x1xf32>
    %270 = arith.mulf %269, %263 : vector<32x1xf32>
    %cst_82 = arith.constant dense<0.000000e+00> : vector<1xf32>
    %271 = vector.multi_reduction <add>, %270, %cst_82 [0] : vector<32x1xf32> to vector<1xf32>
    %272 = vector.shape_cast %271 : vector<1xf32> to vector<1x1xf32>
    %cst_83 = arith.constant 8.000000e+00 : f32
    %273 = vector.broadcast %cst_83 : f32 to vector<1x1xf32>
    %274 = arith.divf %272, %273 : vector<1x1xf32>
    %c0_84 = arith.constant 0 : index
    %c0_85 = arith.constant 0 : index
    %275 = vector.load %arg5[%c0_84, %c0_85] : memref<1x1xf32, #tpu.memory_space<vmem>>, vector<1x1xf32>
    tpu.vector_store %arg5[%c0_84, %c0_85], %274 {strides = array<i32>} : memref<1x1xf32, #tpu.memory_space<vmem>>, vector<1x1xf32>,
    return
  }
}

</mosaic_0001>

<bundles_post_ra>
// kernel: tpu_custom_call.1
= control target key start
LH: loop header
LB: loop body
LE: loop exit
PB: predicated region body
PF: predicated region fallthrough
CT: control target
= control target key end

     0   :  { %11 = vsyncpa [#allocation5], 0  ;;  %s1885_s0 = inlined_call_operand.vmem [shape: f32[64,2], index: 0, kind: input, shape index: {}]   ;;  %s1886_s1 = inlined_call_operand.hbm [shape: f32[32,128], index: 1, kind: input, shape index: {}]   ;;  %s1887_s2 = inlined_call_operand.vmem [shape: f32[48,128], index: 2, kind: input, shape index: {}]   ;;  %s1888_s3 = inlined_call_operand.hbm [shape: bf16[448,128], index: 3, kind: input, shape index: {}]   ;;  %s1889_s4 = inlined_call_operand.hbm [shape: f32[32,128], index: 4, kind: output, shape index: {0}]   ;;  %s1890_s5 = inlined_call_operand.hbm [shape: f32[1,1], index: 5, kind: output, shape index: {1}]  }
   0x1   :  { %12 = vsyncpa [#allocation8], 0 }
   0x2   :  { %13 = vsyncpa [#allocation6], 0 }
   0x3   :  { %14 = vsyncpa [#allocation11], 0  ;;  %s21_s20 = sshll.u32 %s1886_s1, 4  ;;  %s1601_s21 = smov [#allocation4]   ;;  %s22_s20 = int_to_ptr.hbm [resolvable:$true] %s21_s20 }
   0x4   :  { %s23_s22 = sshll.u32 %s1601_s21, 4  ;;  %s36_s25 = sshll.u32 %s1888_s3, 4  ;;  %s24_s22 = int_to_ptr.vmem [resolvable:$true] %s23_s22  ;;  %s37_s25 = int_to_ptr.hbm [resolvable:$true] %s36_s25 }
   0x5   :  { %s1602_s26 = smov 128   ;;  %s1603_s27 = smov 8  }
   0x6   :  { %29 = dma.hbm_to_vmem [thread:$0]  %s22_s20, 512, %s24_s22, [#allocation5], %s1602_s26, %s1602_s26, %s1603_s27  }
   0x7   :  { %s1604_s28 = smov [#allocation7]   ;;  %s1605_s30 = smov 64  }
   0x8   :  { %s38_s29 = sshll.u32 %s1604_s28, 4  ;;  %s1606_s1 = smov 4   ;;  %s39_s29 = int_to_ptr.vmem [resolvable:$true] %s38_s29 }
   0x9   :  { %44 = dma.hbm_to_vmem [thread:$0]  %s37_s25, 3584, %s39_s29, [#allocation8], %s1605_s30, %s1605_s30, %s1606_s1  }
   0xa   :  { %1593 = dma.done.wait [#allocation5], 512  }
   0xb   :  { %1594 = vsyncadd [#allocation5], 4294966784 }
   0xc   :  { %1595 = dma.done.wait [#allocation8], 3584  }
   0xd   :  { %1596 = vsyncadd [#allocation8], 4294963712  ;;  %v1607_v0 = vmov 1   ;;  %v1608_v1 = vmov 0   ;;  %v54_v2 = vld [vmem:[%s1885_s0] sm:$0xff]  ;;  %v1373_v3 = vld [vmem:[#allocation7 + $0x38] sm:$0xff] }
   0xe   :  { %1408 = vset.pattern.permute.xlu1 %v1607_v0  ;;  %1407 = vset.pattern.permute.xlu0 %v1608_v1  ;;  %v1372_v4 = vld [vmem:[#allocation7 + $0x30] sm:$0xff]  ;;  %v55_v5 = vld [vmem:[%s1885_s0 + $0x8] sm:$0xff]  ;;  %v1370_v7 = vld [vmem:[#allocation7 + $0x20] sm:$0xff]  ;;  %s1609_s23 = smov 32   ;;  %vm403_vm4 = vcmask 261120   ;;  %s1203_s11 = sshll.u32 %s1889_s4, 4  ;;  %s1204_s11 = int_to_ptr.hbm [resolvable:$true] %s1203_s11 }
   0xf   :  { %1410 = vset.pattern.permute.xlu2 %v1607_v0  ;;  %124 = vperm.xlu1 %1408, %v54_v2   ;;  %v1371_v6 = vld [vmem:[#allocation7 + $0x28] sm:$0xff]  ;;  %v1667_v8 = vld [vmem:[%s1885_s0 + $0x10] sm:$0xff]  ;;  %v1369_v9 = vld [vmem:[#allocation7 + $0x18] sm:$0xff]  ;;  %s1610_s12 = smov [#allocation9]   ;;  %s1613_s4 = smov [#allocation10]  }
  0x10   :  { %65 = vperm.xlu0 %1407, %v54_v2   ;;  %250 = vmatpush.bf16.msra.mxu0 %v1373_v3  ;;  %v1368_v10 = vld [vmem:[#allocation7 + $0x10] sm:$0xff]  ;;  %v1367_v11 = vld [vmem:[#allocation7 + $0x8] sm:$0xff]  ;;  %v1366_v12 = vld [vmem:[#allocation7] sm:$0xff]  ;;  %s1201_s13 = sshll.u32 %s1610_s12, 4  ;;  %s1217_s15 = sshll.u32 %s1890_s5, 4  ;;  %s1202_s13 = int_to_ptr.vmem [resolvable:$true] %s1201_s13  ;;  %s1218_s15 = int_to_ptr.hbm [resolvable:$true] %s1217_s15 }
  0x11   :  { %v1381_v13 = vld [vmem:[#allocation7 + $0x78] sm:$0xff]  ;;  %v1672_v14 = vld [vmem:[#allocation7 + $0x88] sm:$0xff]  ;;  %v1380_v15 = vld [vmem:[#allocation7 + $0x70] sm:$0xff] }
  0x12   :  { %349 = vmatpush.bf16.msra.mxu1 %v1381_v13  ;;  %413 = vmatpush.bf16.msra.mxu2 %v1672_v14  ;;  %v1675_v16 = vld [vmem:[#allocation7 + $0x80] sm:$0xff]  ;;  %v1379_v17 = vld [vmem:[#allocation7 + $0x68] sm:$0xff]  ;;  %v1377_v22 = vld [vmem:[#allocation7 + $0x58] sm:$0xff] }
  0x13   :  { %593 = vmatpush.bf16.msra.mxu3 %v1672_v14  ;;  %v1378_v18 = vld [vmem:[#allocation7 + $0x60] sm:$0xff]  ;;  %v1701_v24 = vld [vmem:[%s1887_s2 + $0x8] ss:$0 sm:$0xff]  ;;  %v1376_v38 = vld [vmem:[#allocation7 + $0x50] sm:$0xff] }
  0x14   :  { %251 = vmatpush.bf16.msra.mxu0 %v1372_v4  ;;  %v1688_v19 = vld [vmem:[%s1887_s2] ss:$0 sm:$0xff]  ;;  %v1696_v23 = vld [vmem:[%s1887_s2 + $0x1] ss:$0 sm:$0xff]  ;;  %v1375_v39 = vld [vmem:[#allocation7 + $0x48] sm:$0xff] }
  0x15   :  { %v1374_v40 = vld [vmem:[#allocation7 + $0x40] sm:$0xff]  ;;  %v1713_v44 = vld [vmem:[%s1887_s2 + $0x10] ss:$0 sm:$0xff]  ;;  %v57_v49 = vld [vmem:[%s1885_s0 + $0x18] sm:$0xff] }
  0x16   :  { %350 = vmatpush.bf16.msra.mxu1 %v1380_v15  ;;  %414 = vmatpush.bf16.msra.mxu2 %v1675_v16  ;;  %v1723_v50 = vld [vmem:[%s1887_s2 + $0x18] ss:$0 sm:$0xff] }
  0x17   :  { %128 = vperm.xlu1 %1408, %v55_v5   ;;  %594 = vmatpush.bf16.msra.mxu3 %v1675_v16 }
  0x18   :  { %70 = vperm.xlu0 %1407, %v55_v5   ;;  %252 = vmatpush.bf16.msra.mxu0 %v1371_v6 }
  0x19   :  { %415 = vmatmul.bf16.vlgmr.msra.gmra.mxu2 %v1608_v1 }
  0x1a   :  { %533 = vmatpush.bf16.msrb.mxu2 %v1672_v14  ;;  %351 = vmatpush.bf16.msra.mxu1 %v1379_v17 }
  0x1b   :  { %718 = vmatpush.bf16.msrb.mxu3 %v1672_v14 }
  0x1c   :  { %253 = vmatpush.bf16.msra.mxu0 %v1370_v7 }
  0x1e   :  { %534 = vmatpush.bf16.msrb.mxu2 %v1675_v16  ;;  %352 = vmatpush.bf16.msra.mxu1 %v1378_v18 }
  0x1f   :  { %1409 = vset.pattern.permute.xlu1 %v1608_v1  ;;  %719 = vmatpush.bf16.msrb.mxu3 %v1675_v16 }
  0x20   :  { %75 = vperm.xlu0 %1407, %v1667_v8   ;;  %254 = vmatpush.bf16.msra.mxu0 %v1369_v9  ;;  %v59_v9 = vld [vmem:[%s1885_s0 + $0x28] sm:$0xff] }
  0x21   :  { %80 = vperm.xlu1 %1409, %v57_v49  }
  0x22   :  { %653 = vmatpush.bf16.msra.mxu2 %v1672_v14  ;;  %353 = vmatpush.bf16.msra.mxu1 %v1377_v22 }
  0x24   :  { %255 = vmatpush.bf16.msra.mxu0 %v1368_v10 }
  0x26   :  { %654 = vmatpush.bf16.msra.mxu2 %v1675_v16  ;;  %354 = vmatpush.bf16.msra.mxu1 %v1376_v38 }
  0x28   :  { %1411 = vset.pattern.permute.xlu0 %v1607_v0  ;;  %256 = vmatpush.bf16.msra.mxu0 %v1367_v11  ;;  %v60_v11 = vld [vmem:[%s1885_s0 + $0x30] sm:$0xff] }
  0x29   :  { %136 = vperm.xlu0 %1411, %v57_v49  }
  0x2a   :  { %355 = vmatpush.bf16.msra.mxu1 %v1375_v39 }
  0x2c   :  { %257 = vmatpush.bf16.msra.mxu0 %v1366_v12 }
  0x2e   :  { %356 = vmatpush.bf16.msra.mxu1 %v1374_v40 }
  0x30   :  { %473 = vmatpush.bf16.msrb.mxu0 %v1672_v14 }
  0x31   :  { %144 = vperm.xlu0 %1411, %v59_v9  }
  0x34   :  { %474 = vmatpush.bf16.msrb.mxu0 %v1675_v16 }
  0x39   :  { %148 = vperm.xlu0 %1411, %v60_v11  }
  0x81   :  { %v125_v20 = vpop.permute.xlu1 %124 }
  0x82   :  { %v66_v21 = vpop.permute.xlu0 %65  ;;  %v156_v26 = vmul.f32 %v1696_v23, %v125_v20  ;;  %v58_v20 = vld [vmem:[%s1885_s0 + $0x20] sm:$0xff] }
  0x83   :  { %v104_v25 = vmul.f32 %v1688_v19, %v66_v21 }
  0x85   :  { %v114_v27 = vadd.f32 %v1701_v24, %v104_v25 }
  0x87   :  { %v164_v33 = vadd.f32 %v156_v26, %v114_v27 }
  0x89   :  { %v129_v28 = vpop.permute.xlu1 %128  ;;  %v172_v35 = vmax.f32 %v164_v33, 0.0 }
  0x8a   :  { %v71_v29 = vpop.permute.xlu0 %70  ;;  %v157_v31 = vmul.f32 %v1696_v23, %v129_v28 }
  0x8b   :  { %v105_v30 = vmul.f32 %v1688_v19, %v71_v29 }
  0x8d   :  { %v115_v32 = vadd.f32 %v1701_v24, %v105_v30 }
  0x8f   :  { %v165_v34 = vadd.f32 %v157_v31, %v115_v32 }
  0x91   :  { %v173_v36 = vmax.f32 %v165_v34, 0.0 }
  0x92   :  { %v76_v10 = vpop.permute.xlu0 %75 }
  0x93   :  { %v180_v37 = vpack.c.bf16 %v173_v36, %v172_v35  ;;  %v81_v12 = vpop.permute.xlu1 %80  ;;  %v106_v25 = vmul.f32 %v1688_v19, %v76_v10  ;;  %v61_v35 = vld [vmem:[%s1885_s0 + $0x38] sm:$0xff] }
  0x94   :  { %v107_v15 = vmul.f32 %v1688_v19, %v81_v12 }
  0x95   :  { %258 = vmatmul.bf16.vlgmr.msra.gmra.mxu0 %v180_v37  ;;  %v116_v29 = vadd.f32 %v1701_v24, %v106_v25 }
  0x96   :  { %v117_v21 = vadd.f32 %v1701_v24, %v107_v15 }
  0x9b   :  { %v137_v18 = vpop.permute.xlu0 %136 }
  0x9c   :  { %v416_v41 = vpop.f32.mrf.mxu2  ;;  %v159_v22 = vmul.f32 %v1696_v23, %v137_v18 }
  0x9e   :  { %v167_v26 = vadd.f32 %v159_v22, %v117_v21 }
  0xa0   :  { %v175_v32 = vmax.f32 %v167_v26, 0.0 }
  0xa4   :  { %v418_v42 = vpop.f32.mrf.mxu2 }
 0x112   :  { %v259_v43 = vpop.f32.mrf.mxu0 }
 0x113   :  { %v260_v46 = vadd.f32 %v1713_v44, %v259_v43 }
 0x11a   :  { %v261_v45 = vpop.f32.mrf.mxu0 }
 0x11b   :  { %v262_v47 = vadd.f32 %v1713_v44, %v261_v45  ;;  %v145_v45 = vpop.permute.xlu0 %144 }
 0x11d   :  { %v279_v48 = vpack.c.bf16 %v262_v47, %v260_v46 }
 0x11f   :  { %357 = vmatmul.bf16.vlgmr.msra.gmra.mxu1 %v279_v48 }
 0x19c   :  { %v358_v51 = vpop.f32.mrf.mxu1 }
 0x19d   :  { %v359_v52 = vadd.f32 %v1723_v50, %v358_v51 }
 0x19f   :  { %v420_v53 = vadd.f32 %v416_v41, %v359_v52 }
 0x1a1   :  { %1423 = vtanh.f32 %v420_v53  ;;  %v1305_v55 = vmul.f32 -1.442695, %v420_v53 }
 0x1a3   :  { %1425 = vpow2.f32 %v1305_v55 }
 0x1a4   :  { %v360_v26 = vpop.f32.mrf.mxu1 }
 0x1a7   :  { %v1424_v54 = vpop.eup %1423 }
 0x1a8   :  { %443 = vrot.lane.b32.xlu2 %v1424_v54, %s1605_s30 }
 0x1a9   :  { %v1426_v56 = vpop.eup %1425 }
 0x1aa   :  { %v424_v57 = vadd.f32 1.0, %v1426_v56 }
 0x1ac   :  { %1427 = vrcp.f32 %v424_v57  ;;  %v436_v63 = vand.u32 2147483648, %v424_v57  ;;  %vm430_vm1 = vweird.f32 %v424_v57  ;;  %v434_v2 = vand.u32 2147483647, %v424_v57 }
 0x1ae   :  { %v437_v4 = vor.u32 1.1754944e-38, %v436_v63  ;;  %vm435_vm3 = vcmp.eq.f32.partialorder %v434_v2, 8.507059e+37 }
 0x1b2   :  { %v1428_v58 = vpop.eup %1427 }
 0x1b3   :  { %v426_v59 = vmul.f32 %v1428_v58, %v424_v57  ;;  %vm431_vm0 = vweird.f32 %v1428_v58 }
 0x1b4   :  { %vm432_vm2 = vmor %vm430_vm1, %vm431_vm0 }
 0x1b5   :  { %v427_v60 = vsub.f32 1.0, %v426_v59 }
 0x1b7   :  { %v428_v61 = vmul.f32 %v1428_v58, %v427_v60 }
 0x1b9   :  { %v429_v62 = vadd.f32 %v1428_v58, %v428_v61 }
 0x1bb   :  { %v433_v3 = vsel %vm432_vm2, %v1428_v58, %v429_v62  ;;  %v149_v58 = vpop.permute.xlu0 %148 }
 0x1bc   :  { %v438_v6 = vsel %vm435_vm3, %v437_v4, %v433_v3  ;;  %v162_v61 = vmul.f32 %v1696_v23, %v149_v58 }
 0x1bd   :  { %v441_v13 = vmul.f32 0.0, %v438_v6 }
 0x202   :  { %v444_v5 = vpop.permute.xlu2 %443 }
 0x203   :  { %v446_v7 = vmul.f32 %v444_v5, %v438_v6 }
 0x205   :  { %448 = vrot.lane.b32.xlu2 %v446_v7, %s1609_s23 }
 0x20d   :  { %132 = vperm.xlu2 %1410, %v1667_v8  }
 0x215   :  { %1412 = vset.pattern.permute.xlu2 %v1608_v1 }
 0x216   :  { %85 = vperm.xlu2 %1412, %v58_v20  }
 0x21e   :  { %1413 = vset.pattern.permute.xlu2 %v1607_v0 }
 0x21f   :  { %140 = vperm.xlu2 %1413, %v58_v20  }
 0x227   :  { %1414 = vset.pattern.permute.xlu2 %v1608_v1 }
 0x228   :  { %100 = vperm.xlu2 %1414, %v61_v35  }
 0x25f   :  { %v449_v17 = vpop.permute.xlu2 %448 }
 0x260   :  { %v1737_v8 = vadd.f32 %v449_v17, %v441_v13 }
 0x262   :  { %1429 = vtanh.f32 %v1737_v8 }
 0x267   :  { %v133_v27 = vpop.permute.xlu2 %132 }
 0x268   :  { %v1430_v28 = vpop.eup %1429  ;;  %v158_v30 = vmul.f32 %v1696_v23, %v133_v27  ;;  %v361_v27 = vadd.f32 %v1723_v50, %v360_v26 }
 0x269   :  { %454 = vrot.lane.b32.xlu1 %v1430_v28, %s1605_s30 }
 0x26a   :  { %v166_v31 = vadd.f32 %v158_v30, %v116_v29 }
 0x26c   :  { %v174_v33 = vmax.f32 %v166_v31, 0.0 }
 0x26e   :  { %v181_v34 = vpack.c.bf16 %v175_v32, %v174_v33 }
 0x270   :  { %263 = vmatmul.bf16.gmra.mxu0 %v181_v34  ;;  %v86_v36 = vpop.permute.xlu2 %85 }
 0x271   :  { %90 = vperm.xlu1 %1409, %v59_v9   ;;  %v108_v39 = vmul.f32 %v1688_v19, %v86_v36 }
 0x273   :  { %v118_v42 = vadd.f32 %v1701_v24, %v108_v39 }
 0x279   :  { %95 = vperm.xlu1 %1409, %v60_v11   ;;  %v141_v40 = vpop.permute.xlu2 %140 }
 0x27a   :  { %v160_v43 = vmul.f32 %v1696_v23, %v141_v40 }
 0x27c   :  { %v168_v47 = vadd.f32 %v160_v43, %v118_v42 }
 0x27e   :  { %v176_v49 = vmax.f32 %v168_v47, 0.0 }
 0x281   :  { %1415 = vset.pattern.permute.xlu1 %v1607_v0  ;;  %v161_v0 = vmul.f32 %v1696_v23, %v145_v45 }
 0x282   :  { %152 = vperm.xlu1 %1415, %v61_v35   ;;  %v101_v55 = vpop.permute.xlu2 %100 }
 0x283   :  { %v111_v59 = vmul.f32 %v1688_v19, %v101_v55 }
 0x285   :  { %v121_v62 = vadd.f32 %v1701_v24, %v111_v59 }
 0x2db   :  { %v455_v37 = vpop.permute.xlu1 %454 }
 0x2dc   :  { %v457_v38 = vmul.f32 %v455_v37, %v438_v6 }
 0x2de   :  { %v458_v41 = vpack.c.bf16 %v457_v38, %v457_v38 }
 0x2e0   :  { %462 = vrot.lane.b32.xlu2 %v458_v41, %s1609_s23 }
 0x2e3   :  { %v91_v1 = vpop.permute.xlu1 %90 }
 0x2e4   :  { %v109_v46 = vmul.f32 %v1688_v19, %v91_v1 }
 0x2e6   :  { %v119_v48 = vadd.f32 %v1701_v24, %v109_v46 }
 0x2e8   :  { %v169_v51 = vadd.f32 %v161_v0, %v119_v48 }
 0x2ea   :  { %v177_v52 = vmax.f32 %v169_v51, 0.0 }
 0x2eb   :  { %v96_v53 = vpop.permute.xlu1 %95 }
 0x2ec   :  { %v182_v54 = vpack.c.bf16 %v177_v52, %v176_v49  ;;  %v110_v56 = vmul.f32 %v1688_v19, %v96_v53 }
 0x2ed   :  { %v264_v57 = vpop.f32.mrf.mxu0 }
 0x2ee   :  { %268 = vmatmul.bf16.gmra.mxu0 %v182_v54  ;;  %v120_v60 = vadd.f32 %v1701_v24, %v110_v56  ;;  %v265_v5 = vadd.f32 %v1713_v44, %v264_v57 }
 0x2f0   :  { %v170_v2 = vadd.f32 %v162_v61, %v120_v60 }
 0x2f2   :  { %v178_v10 = vmax.f32 %v170_v2, 0.0 }
 0x2f4   :  { %v153_v63 = vpop.permute.xlu1 %152 }
 0x2f5   :  { %v163_v3 = vmul.f32 %v1696_v23, %v153_v63  ;;  %v266_v4 = vpop.f32.mrf.mxu0 }
 0x2f6   :  { %v267_v6 = vadd.f32 %v1713_v44, %v266_v4 }
 0x2f7   :  { %v171_v7 = vadd.f32 %v163_v3, %v121_v62 }
 0x2f8   :  { %v280_v9 = vpack.c.bf16 %v267_v6, %v265_v5 }
 0x2f9   :  { %v179_v11 = vmax.f32 %v171_v7, 0.0 }
 0x2fa   :  { %362 = vmatmul.bf16.gmra.mxu1 %v280_v9 }
 0x2fb   :  { %v183_v19 = vpack.c.bf16 %v179_v11, %v178_v10 }
 0x2fe   :  { %273 = vmatmul.bf16.gmra.mxu0 %v183_v19 }
 0x33a   :  { %v463_v12 = vpop.permute.xlu2 %462 }
 0x33b   :  { %1306 = vmatmul.msk.bf16.vlgmr.msrb.gmra.mxu0 %vm403_vm4, %v463_v12 }
 0x36b   :  { %v269_v24 = vpop.f32.mrf.mxu0 }
 0x36c   :  { %v270_v23 = vadd.f32 %v1713_v44, %v269_v24 }
 0x373   :  { %v271_v13 = vpop.f32.mrf.mxu0 }
 0x374   :  { %v272_v15 = vadd.f32 %v1713_v44, %v271_v13 }
 0x376   :  { %v281_v17 = vpack.c.bf16 %v272_v15, %v270_v23 }
 0x377   :  { %v363_v54 = vpop.f32.mrf.mxu1 }
 0x378   :  { %367 = vmatmul.bf16.gmra.mxu1 %v281_v17 }
 0x37b   :  { %v274_v18 = vpop.f32.mrf.mxu0 }
 0x37c   :  { %v275_v21 = vadd.f32 %v1713_v44, %v274_v18 }
 0x383   :  { %v276_v20 = vpop.f32.mrf.mxu0 }
 0x384   :  { %v277_v22 = vadd.f32 %v1713_v44, %v276_v20 }
 0x386   :  { %v282_v25 = vpack.c.bf16 %v277_v22, %v275_v21  ;;  %v365_v21 = vpop.f32.mrf.mxu1 }
 0x387   :  { %v366_v22 = vadd.f32 %v1723_v50, %v365_v21 }
 0x388   :  { %372 = vmatmul.bf16.gmra.mxu1 %v282_v25 }
 0x3b8   :  { %v476_v28 = vpop.f32.mrf.mxu0 }
 0x3b9   :  { %v480_v29 = vadd.f32 %v476_v28, %v361_v27 }
 0x3bb   :  { %1431 = vtanh.f32 %v480_v29  ;;  %v1307_v32 = vmul.f32 -1.442695, %v480_v29 }
 0x3bd   :  { %1433 = vpow2.f32 %v1307_v32 }
 0x3c0   :  { %v478_v30 = vpop.f32.mrf.mxu0 }
 0x3c1   :  { %v1432_v31 = vpop.eup %1431 }
 0x3c2   :  { %503 = vrot.lane.b32.xlu0 %v1432_v31, %s1605_s30 }
 0x3c3   :  { %v1434_v33 = vpop.eup %1433 }
 0x3c4   :  { %v484_v34 = vadd.f32 1.0, %v1434_v33 }
 0x3c6   :  { %1435 = vrcp.f32 %v484_v34  ;;  %v496_v39 = vand.u32 2147483648, %v484_v34  ;;  %vm490_vm6 = vweird.f32 %v484_v34  ;;  %v494_v40 = vand.u32 2147483647, %v484_v34 }
 0x3c8   :  { %v497_v42 = vor.u32 1.1754944e-38, %v496_v39  ;;  %vm495_vm8 = vcmp.eq.f32.partialorder %v494_v40, 8.507059e+37 }
 0x3cc   :  { %v1436_v35 = vpop.eup %1435 }
 0x3cd   :  { %v486_v36 = vmul.f32 %v1436_v35, %v484_v34  ;;  %vm491_vm5 = vweird.f32 %v1436_v35 }
 0x3ce   :  { %vm492_vm7 = vmor %vm490_vm6, %vm491_vm5 }
 0x3cf   :  { %v487_v44 = vsub.f32 1.0, %v486_v36 }
 0x3d1   :  { %v488_v37 = vmul.f32 %v1436_v35, %v487_v44 }
 0x3d3   :  { %v489_v38 = vadd.f32 %v1436_v35, %v488_v37 }
 0x3d5   :  { %v493_v41 = vsel %vm492_vm7, %v1436_v35, %v489_v38 }
 0x3d6   :  { %v498_v45 = vsel %vm495_vm8, %v497_v42, %v493_v41 }
 0x3d7   :  { %v501_v46 = vmul.f32 %v498_v45, %v1737_v8  ;;  %v364_v8 = vadd.f32 %v1723_v50, %v363_v54 }
 0x434   :  { %v504_v43 = vpop.permute.xlu0 %503 }
 0x435   :  { %v506_v1 = vmul.f32 %v504_v43, %v498_v45 }
 0x437   :  { %508 = vrot.lane.b32.xlu1 %v506_v1, %s1609_s23 }
 0x4a9   :  { %v509_v47 = vpop.permute.xlu1 %508 }
 0x4aa   :  { %v511_v0 = vadd.f32 %v509_v47, %v501_v46 }
 0x4ac   :  { %1437 = vtanh.f32 %v511_v0 }
 0x4b2   :  { %v1438_v48 = vpop.eup %1437 }
 0x4b3   :  { %514 = vrot.lane.b32.xlu2 %v1438_v48, %s1605_s30  ;;  %v368_v48 = vpop.f32.mrf.mxu1 }
 0x50d   :  { %v515_v49 = vpop.permute.xlu2 %514 }
 0x50e   :  { %v517_v51 = vmul.f32 %v515_v49, %v498_v45  ;;  %v369_v49 = vadd.f32 %v1723_v50, %v368_v48 }
 0x510   :  { %v518_v52 = vpack.c.bf16 %v517_v51, %v517_v51 }
 0x512   :  { %522 = vrot.lane.b32.xlu0 %v518_v52, %s1609_s23 }
 0x584   :  { %v523_v53 = vpop.permute.xlu0 %522 }
 0x585   :  { %1308 = vmatmul.msk.bf16.vlgmr.msrb.gmra.mxu2 %vm403_vm4, %v523_v53 }
 0x586   :  { %784 = vmatpush.bf16.msrb.mxu2 %v1672_v14 }
 0x58a   :  { %785 = vmatpush.bf16.msrb.mxu2 %v1675_v16 }
 0x608   :  { %v536_v55 = vpop.f32.mrf.mxu2 }
 0x609   :  { %v540_v56 = vadd.f32 %v536_v55, %v364_v8 }
 0x60b   :  { %1439 = vtanh.f32 %v540_v56  ;;  %v1309_v59 = vmul.f32 -1.442695, %v540_v56 }
 0x60d   :  { %1441 = vpow2.f32 %v1309_v59 }
 0x610   :  { %v538_v57 = vpop.f32.mrf.mxu2 }
 0x611   :  { %v1440_v58 = vpop.eup %1439 }
 0x612   :  { %563 = vrot.lane.b32.xlu1 %v1440_v58, %s1605_s30 }
 0x613   :  { %v1442_v60 = vpop.eup %1441 }
 0x614   :  { %v544_v61 = vadd.f32 1.0, %v1442_v60 }
 0x616   :  { %1443 = vrcp.f32 %v544_v61  ;;  %v556_v5 = vand.u32 2147483648, %v544_v61  ;;  %vm550_vm10 = vweird.f32 %v544_v61  ;;  %v554_v6 = vand.u32 2147483647, %v544_v61 }
 0x618   :  { %v557_v9 = vor.u32 1.1754944e-38, %v556_v5  ;;  %vm555_vm12 = vcmp.eq.f32.partialorder %v554_v6, 8.507059e+37 }
 0x61c   :  { %v1444_v62 = vpop.eup %1443 }
 0x61d   :  { %v546_v63 = vmul.f32 %v1444_v62, %v544_v61  ;;  %vm551_vm9 = vweird.f32 %v1444_v62 }
 0x61e   :  { %vm552_vm11 = vmor %vm550_vm10, %vm551_vm9 }
 0x61f   :  { %v547_v2 = vsub.f32 1.0, %v546_v63 }
 0x621   :  { %v548_v3 = vmul.f32 %v1444_v62, %v547_v2 }
 0x623   :  { %v549_v4 = vadd.f32 %v1444_v62, %v548_v3 }
 0x625   :  { %v553_v7 = vsel %vm552_vm11, %v1444_v62, %v549_v4 }
 0x626   :  { %v558_v11 = vsel %vm555_vm12, %v557_v9, %v553_v7 }
 0x627   :  { %v561_v12 = vmul.f32 %v558_v11, %v511_v0 }
 0x684   :  { %v564_v10 = vpop.permute.xlu1 %563 }
 0x685   :  { %v566_v19 = vmul.f32 %v564_v10, %v558_v11 }
 0x687   :  { %568 = vrot.lane.b32.xlu2 %v566_v19, %s1609_s23 }
 0x6e1   :  { %v569_v24 = vpop.permute.xlu2 %568 }
 0x6e2   :  { %v571_v13 = vadd.f32 %v569_v24, %v561_v12 }
 0x6e4   :  { %1445 = vtanh.f32 %v571_v13 }
 0x6ea   :  { %v1446_v23 = vpop.eup %1445 }
 0x6eb   :  { %574 = vrot.lane.b32.xlu0 %v1446_v23, %s1605_s30  ;;  %v370_v23 = vpop.f32.mrf.mxu1 }
 0x75d   :  { %v575_v15 = vpop.permute.xlu0 %574 }
 0x75e   :  { %v577_v17 = vmul.f32 %v575_v15, %v558_v11  ;;  %v371_v15 = vadd.f32 %v1723_v50, %v370_v23 }
 0x760   :  { %v578_v18 = vpack.c.bf16 %v577_v17, %v577_v17 }
 0x762   :  { %582 = vrot.lane.b32.xlu1 %v578_v18, %s1609_s23 }
 0x7d4   :  { %v583_v20 = vpop.permute.xlu1 %582 }
 0x7d5   :  { %1310 = vmatmul.msk.bf16.vlgmr.msra.gmra.mxu3 %vm403_vm4, %v583_v20 }
 0x7d6   :  { %850 = vmatpush.bf16.msra.mxu3 %v1672_v14 }
 0x7da   :  { %851 = vmatpush.bf16.msra.mxu3 %v1675_v16 }
 0x858   :  { %v596_v25 = vpop.f32.mrf.mxu3 }
 0x859   :  { %v600_v26 = vadd.f32 %v596_v25, %v366_v22 }
 0x85b   :  { %1447 = vtanh.f32 %v600_v26  ;;  %v1311_v29 = vmul.f32 -1.442695, %v600_v26 }
 0x85d   :  { %1449 = vpow2.f32 %v1311_v29 }
 0x860   :  { %v598_v27 = vpop.f32.mrf.mxu3 }
 0x861   :  { %v1448_v28 = vpop.eup %1447 }
 0x862   :  { %623 = vrot.lane.b32.xlu2 %v1448_v28, %s1605_s30 }
 0x863   :  { %v1450_v30 = vpop.eup %1449 }
 0x864   :  { %v604_v31 = vadd.f32 1.0, %v1450_v30 }
 0x866   :  { %1451 = vrcp.f32 %v604_v31  ;;  %v616_v35 = vand.u32 2147483648, %v604_v31  ;;  %vm610_vm14 = vweird.f32 %v604_v31  ;;  %v614_v36 = vand.u32 2147483647, %v604_v31 }
 0x868   :  { %v617_v37 = vor.u32 1.1754944e-38, %v616_v35  ;;  %vm615_vm0 = vcmp.eq.f32.partialorder %v614_v36, 8.507059e+37 }
 0x86c   :  { %v1452_v32 = vpop.eup %1451 }
 0x86d   :  { %v606_v33 = vmul.f32 %v1452_v32, %v604_v31  ;;  %vm611_vm13 = vweird.f32 %v1452_v32 }
 0x86e   :  { %vm612_vm15 = vmor %vm610_vm14, %vm611_vm13 }
 0x86f   :  { %v607_v14 = vsub.f32 1.0, %v606_v33 }
 0x871   :  { %v608_v34 = vmul.f32 %v1452_v32, %v607_v14 }
 0x873   :  { %v609_v16 = vadd.f32 %v1452_v32, %v608_v34 }
 0x875   :  { %v613_v44 = vsel %vm612_vm15, %v1452_v32, %v609_v16 }
 0x876   :  { %v618_v39 = vsel %vm615_vm0, %v617_v37, %v613_v44 }
 0x877   :  { %v621_v41 = vmul.f32 %v618_v39, %v571_v13 }
 0x8bc   :  { %v624_v38 = vpop.permute.xlu2 %623 }
 0x8bd   :  { %v626_v40 = vmul.f32 %v624_v38, %v618_v39 }
 0x8bf   :  { %628 = vrot.lane.b32.xlu0 %v626_v40, %s1609_s23 }
 0x931   :  { %v629_v42 = vpop.permute.xlu0 %628 }
 0x932   :  { %v631_v43 = vadd.f32 %v629_v42, %v621_v41 }
 0x934   :  { %1453 = vtanh.f32 %v631_v43 }
 0x93a   :  { %v1454_v45 = vpop.eup %1453 }
 0x93b   :  { %634 = vrot.lane.b32.xlu1 %v1454_v45, %s1605_s30  ;;  %v373_v45 = vpop.f32.mrf.mxu1 }
 0x9ad   :  { %v635_v1 = vpop.permute.xlu1 %634 }
 0x9ae   :  { %v637_v46 = vmul.f32 %v635_v1, %v618_v39  ;;  %v374_v1 = vadd.f32 %v1723_v50, %v373_v45  ;;  %v1390_v45 = vld [vmem:[#allocation7 + $0xc0] sm:$0xff] }
 0x9b0   :  { %v638_v47 = vpack.c.bf16 %v637_v46, %v637_v46 }
 0x9b2   :  { %642 = vrot.lane.b32.xlu2 %v638_v47, %s1609_s23 }
 0xa0c   :  { %v643_v0 = vpop.permute.xlu2 %642 }
 0xa0d   :  { %1312 = vmatmul.msk.bf16.vlgmr.msra.gmra.mxu2 %vm403_vm4, %v643_v0 }
 0xa90   :  { %v656_v51 = vpop.f32.mrf.mxu2 }
 0xa91   :  { %v660_v52 = vadd.f32 %v656_v51, %v369_v49 }
 0xa93   :  { %1455 = vtanh.f32 %v660_v52  ;;  %v1313_v8 = vmul.f32 -1.442695, %v660_v52 }
 0xa95   :  { %1457 = vpow2.f32 %v1313_v8 }
 0xa98   :  { %v658_v53 = vpop.f32.mrf.mxu2 }
 0xa99   :  { %v1456_v54 = vpop.eup %1455 }
 0xa9a   :  { %683 = vrot.lane.b32.xlu0 %v1456_v54, %s1605_s30 }
 0xa9b   :  { %v1458_v55 = vpop.eup %1457 }
 0xa9c   :  { %v664_v56 = vadd.f32 1.0, %v1458_v55 }
 0xa9e   :  { %1459 = vrcp.f32 %v664_v56  ;;  %v676_v62 = vand.u32 2147483648, %v664_v56  ;;  %vm670_vm2 = vweird.f32 %v664_v56  ;;  %v674_v63 = vand.u32 2147483647, %v664_v56 }
 0xaa0   :  { %v677_v3 = vor.u32 1.1754944e-38, %v676_v62  ;;  %vm675_vm5 = vcmp.eq.f32.partialorder %v674_v63, 8.507059e+37 }
 0xaa4   :  { %v1460_v57 = vpop.eup %1459 }
 0xaa5   :  { %v666_v58 = vmul.f32 %v1460_v57, %v664_v56  ;;  %vm671_vm1 = vweird.f32 %v1460_v57 }
 0xaa6   :  { %vm672_vm3 = vmor %vm670_vm2, %vm671_vm1 }
 0xaa7   :  { %v667_v59 = vsub.f32 1.0, %v666_v58 }
 0xaa9   :  { %v668_v60 = vmul.f32 %v1460_v57, %v667_v59 }
 0xaab   :  { %v669_v61 = vadd.f32 %v1460_v57, %v668_v60 }
 0xaad   :  { %v673_v2 = vsel %vm672_vm3, %v1460_v57, %v669_v61 }
 0xaae   :  { %v678_v5 = vsel %vm675_vm5, %v677_v3, %v673_v2 }
 0xaaf   :  { %v681_v7 = vmul.f32 %v678_v5, %v631_v43 }
 0xb0c   :  { %v684_v4 = vpop.permute.xlu0 %683 }
 0xb0d   :  { %v686_v6 = vmul.f32 %v684_v4, %v678_v5 }
 0xb0f   :  { %688 = vrot.lane.b32.xlu1 %v686_v6, %s1609_s23 }
 0xb81   :  { %v689_v9 = vpop.permute.xlu1 %688 }
 0xb82   :  { %v691_v10 = vadd.f32 %v689_v9, %v681_v7 }
 0xb84   :  { %1461 = vtanh.f32 %v691_v10 }
 0xb8a   :  { %v1462_v11 = vpop.eup %1461 }
 0xb8b   :  { %694 = vrot.lane.b32.xlu2 %v1462_v11, %s1605_s30  ;;  %v375_v11 = vpop.f32.mrf.mxu1 }
 0xbe5   :  { %v695_v19 = vpop.permute.xlu2 %694 }
 0xbe6   :  { %v1802_v12 = vmul.f32 %v695_v19, %v678_v5  ;;  %v376_v19 = vadd.f32 %v1723_v50, %v375_v11 }
 0xbe8   :  { %v698_v24 = vpack.c.bf16 %v1802_v12, %v1802_v12 }
 0xbea   :  { %707 = vrot.lane.b32.xlu0 %v698_v24, %s1609_s23 }
 0xc5c   :  { %v708_v13 = vpop.permute.xlu0 %707 }
 0xc5d   :  { %1314 = vmatmul.msk.bf16.vlgmr.msrb.gmra.mxu3 %vm403_vm4, %v708_v13 }
 0xce0   :  { %v721_v17 = vpop.f32.mrf.mxu3 }
 0xce1   :  { %v725_v18 = vadd.f32 %v721_v17, %v371_v15 }
 0xce3   :  { %1463 = vtanh.f32 %v725_v18  ;;  %v1315_v22 = vmul.f32 -1.442695, %v725_v18 }
 0xce5   :  { %1465 = vpow2.f32 %v1315_v22 }
 0xce8   :  { %v723_v20 = vpop.f32.mrf.mxu3 }
 0xce9   :  { %v1464_v21 = vpop.eup %1463 }
 0xcea   :  { %748 = vrot.lane.b32.xlu1 %v1464_v21, %s1605_s30 }
 0xceb   :  { %v1466_v25 = vpop.eup %1465 }
 0xcec   :  { %v729_v26 = vadd.f32 1.0, %v1466_v25 }
 0xcee   :  { %1467 = vrcp.f32 %v729_v26  ;;  %v741_v32 = vand.u32 2147483648, %v729_v26  ;;  %vm735_vm7 = vweird.f32 %v729_v26  ;;  %v739_v33 = vand.u32 2147483647, %v729_v26 }
 0xcf0   :  { %v742_v34 = vor.u32 1.1754944e-38, %v741_v32  ;;  %vm740_vm9 = vcmp.eq.f32.partialorder %v739_v33, 8.507059e+37 }
 0xcf4   :  { %v1468_v27 = vpop.eup %1467 }
 0xcf5   :  { %v731_v28 = vmul.f32 %v1468_v27, %v729_v26  ;;  %vm736_vm6 = vweird.f32 %v1468_v27 }
 0xcf6   :  { %vm737_vm8 = vmor %vm735_vm7, %vm736_vm6 }
 0xcf7   :  { %v732_v29 = vsub.f32 1.0, %v731_v28 }
 0xcf9   :  { %v733_v30 = vmul.f32 %v1468_v27, %v732_v29 }
 0xcfb   :  { %v734_v31 = vadd.f32 %v1468_v27, %v733_v30 }
 0xcfd   :  { %v738_v14 = vsel %vm737_vm8, %v1468_v27, %v734_v31 }
 0xcfe   :  { %v743_v35 = vsel %vm740_vm9, %v742_v34, %v738_v14  ;;  %v1385_v14 = vld [vmem:[#allocation7 + $0x98] sm:$0xff]  ;;  %v1384_v34 = vld [vmem:[#allocation7 + $0x90] sm:$0xff] }
 0xcff   :  { %v746_v44 = vmul.f32 %v743_v35, %v691_v10  ;;  %937 = vmatpush.bf16.msra.mxu2 %v1385_v14 }
 0xd03   :  { %938 = vmatpush.bf16.msra.mxu2 %v1384_v34 }
 0xd5c   :  { %v749_v16 = vpop.permute.xlu1 %748 }
 0xd5d   :  { %v751_v36 = vmul.f32 %v749_v16, %v743_v35 }
 0xd5f   :  { %753 = vrot.lane.b32.xlu2 %v751_v36, %s1609_s23 }
 0xdb9   :  { %v754_v37 = vpop.permute.xlu2 %753 }
 0xdba   :  { %v756_v38 = vadd.f32 %v754_v37, %v746_v44 }
 0xdbc   :  { %1469 = vtanh.f32 %v756_v38 }
 0xdc2   :  { %v1470_v39 = vpop.eup %1469 }
 0xdc3   :  { %759 = vrot.lane.b32.xlu0 %v1470_v39, %s1605_s30 }
 0xe35   :  { %v760_v40 = vpop.permute.xlu0 %759 }
 0xe36   :  { %v1812_v41 = vmul.f32 %v760_v40, %v743_v35 }
 0xe38   :  { %v763_v42 = vpack.c.bf16 %v1812_v41, %v1812_v41 }
 0xe3a   :  { %773 = vrot.lane.b32.xlu1 %v763_v42, %s1609_s23  ;;  %v1392_v42 = vld [vmem:[#allocation7 + $0xd0] sm:$0xff] }
 0xeac   :  { %v774_v43 = vpop.permute.xlu1 %773 }
 0xead   :  { %1316 = vmatmul.msk.bf16.vlgmr.msrb.gmra.mxu2 %vm403_vm4, %v774_v43  ;;  %v1391_v43 = vld [vmem:[#allocation7 + $0xc8] sm:$0xff] }
 0xf30   :  { %v787_v46 = vpop.f32.mrf.mxu2 }
 0xf31   :  { %v791_v47 = vadd.f32 %v787_v46, %v374_v1  ;;  %v1389_v1 = vld [vmem:[#allocation7 + $0xb8] sm:$0xff] }
 0xf33   :  { %1471 = vtanh.f32 %v791_v47  ;;  %v1317_v49 = vmul.f32 -1.442695, %v791_v47 }
 0xf35   :  { %1473 = vpow2.f32 %v1317_v49  ;;  %v1387_v49 = vld [vmem:[#allocation7 + $0xa8] sm:$0xff] }
 0xf38   :  { %v789_v0 = vpop.f32.mrf.mxu2 }
 0xf39   :  { %v1472_v48 = vpop.eup %1471 }
 0xf3a   :  { %814 = vrot.lane.b32.xlu2 %v1472_v48, %s1605_s30  ;;  %v1388_v48 = vld [vmem:[#allocation7 + $0xb0] sm:$0xff] }
 0xf3b   :  { %v1474_v51 = vpop.eup %1473 }
 0xf3c   :  { %v795_v52 = vadd.f32 1.0, %v1474_v51  ;;  %v1386_v51 = vld [vmem:[#allocation7 + $0xa0] sm:$0xff] }
 0xf3e   :  { %1475 = vrcp.f32 %v795_v52  ;;  %v807_v57 = vand.u32 2147483648, %v795_v52  ;;  %vm801_vm11 = vweird.f32 %v795_v52  ;;  %v805_v58 = vand.u32 2147483647, %v795_v52 }
 0xf40   :  { %v808_v60 = vor.u32 1.1754944e-38, %v807_v57  ;;  %vm806_vm13 = vcmp.eq.f32.partialorder %v805_v58, 8.507059e+37 }
 0xf44   :  { %v1476_v53 = vpop.eup %1475 }
 0xf45   :  { %v797_v54 = vmul.f32 %v1476_v53, %v795_v52  ;;  %vm802_vm10 = vweird.f32 %v1476_v53 }
 0xf46   :  { %vm803_vm12 = vmor %vm801_vm11, %vm802_vm10 }
 0xf47   :  { %v798_v8 = vsub.f32 1.0, %v797_v54 }
 0xf49   :  { %v799_v55 = vmul.f32 %v1476_v53, %v798_v8 }
 0xf4b   :  { %v800_v56 = vadd.f32 %v1476_v53, %v799_v55 }
 0xf4d   :  { %v804_v59 = vsel %vm803_vm12, %v1476_v53, %v800_v56  ;;  %v1421_v53 = vld [vmem:[%s1887_s2 + $0x20] ss:$0 sm:$0xff] }
 0xf4e   :  { %v809_v62 = vsel %vm806_vm13, %v808_v60, %v804_v59 }
 0xf4f   :  { %v812_v2 = vmul.f32 %v809_v62, %v756_v38 }
 0xf94   :  { %v815_v61 = vpop.permute.xlu2 %814 }
 0xf95   :  { %v817_v63 = vmul.f32 %v815_v61, %v809_v62  ;;  %v1422_v61 = vld [vmem:[%s1887_s2 + $0x28] ss:$0 sm:$0xff] }
 0xf97   :  { %819 = vrot.lane.b32.xlu0 %v817_v63, %s1609_s23  ;;  %v1106_v63 = vld [vmem:[#allocation4] sm:$0xff] }
0x1009   :  { %v820_v3 = vpop.permute.xlu0 %819 }
0x100a   :  { %v822_v4 = vadd.f32 %v820_v3, %v812_v2 }
0x100c   :  { %1477 = vtanh.f32 %v822_v4 }
0x1012   :  { %v1478_v5 = vpop.eup %1477 }
0x1013   :  { %825 = vrot.lane.b32.xlu1 %v1478_v5, %s1605_s30 }
0x1085   :  { %v826_v6 = vpop.permute.xlu1 %825 }
0x1086   :  { %v828_v7 = vmul.f32 %v826_v6, %v809_v62  ;;  %v1107_v6 = vld [vmem:[#allocation4 + $0x8] sm:$0xff] }
0x1088   :  { %v829_v9 = vpack.c.bf16 %v828_v7, %v828_v7 }
0x108a   :  { %839 = vrot.lane.b32.xlu2 %v829_v9, %s1609_s23 }
0x10e4   :  { %v840_v10 = vpop.permute.xlu2 %839 }
0x10e5   :  { %1318 = vmatmul.msk.bf16.vlgmr.msra.gmra.mxu3 %vm403_vm4, %v840_v10 }
0x1168   :  { %v853_v24 = vpop.f32.mrf.mxu3 }
0x1169   :  { %v857_v13 = vadd.f32 %v853_v24, %v376_v19 }
0x116b   :  { %1479 = vtanh.f32 %v857_v13  ;;  %v1319_v17 = vmul.f32 -1.442695, %v857_v13 }
0x116d   :  { %1481 = vpow2.f32 %v1319_v17  ;;  %v1108_v17 = vld [vmem:[#allocation4 + $0x10] sm:$0xff] }
0x1170   :  { %v855_v23 = vpop.f32.mrf.mxu3 }
0x1171   :  { %v1480_v15 = vpop.eup %1479 }
0x1172   :  { %880 = vrot.lane.b32.xlu0 %v1480_v15, %s1605_s30 }
0x1173   :  { %v1482_v18 = vpop.eup %1481 }
0x1174   :  { %v861_v20 = vadd.f32 1.0, %v1482_v18 }
0x1176   :  { %1483 = vrcp.f32 %v861_v20  ;;  %v873_v27 = vand.u32 2147483648, %v861_v20  ;;  %vm867_vm15 = vweird.f32 %v861_v20  ;;  %v871_v28 = vand.u32 2147483647, %v861_v20 }
0x1178   :  { %v874_v30 = vor.u32 1.1754944e-38, %v873_v27  ;;  %vm872_vm1 = vcmp.eq.f32.partialorder %v871_v28, 8.507059e+37 }
0x117a   :  { %700 = vrot.lane.b32.xlu0 %v1802_v12, %s1609_s23 }
0x117c   :  { %v1484_v21 = vpop.eup %1483 }
0x117d   :  { %v863_v22 = vmul.f32 %v1484_v21, %v861_v20  ;;  %vm868_vm14 = vweird.f32 %v1484_v21 }
0x117e   :  { %vm869_vm0 = vmor %vm867_vm15, %vm868_vm14  ;;  %vm1195_vm15 = vcmask 0  }
0x117f   :  { %v864_v25 = vsub.f32 1.0, %v863_v22 }
0x1181   :  { %v865_v26 = vmul.f32 %v1484_v21, %v864_v25  ;;  %v1109_v25 = vld [vmem:[#allocation4 + $0x18] sm:$0xff] }
0x1183   :  { %v866_v50 = vadd.f32 %v1484_v21, %v865_v26 }
0x1185   :  { %v870_v29 = vsel %vm869_vm0, %v1484_v21, %v866_v50 }
0x1186   :  { %v875_v12 = vsel %vm872_vm1, %v874_v30, %v870_v29 }
0x1187   :  { %v878_v16 = vmul.f32 %v875_v12, %v822_v4 }
0x11e4   :  { %v881_v31 = vpop.permute.xlu0 %880 }
0x11e5   :  { %v883_v32 = vmul.f32 %v881_v31, %v875_v12 }
0x11e7   :  { %885 = vrot.lane.b32.xlu1 %v883_v32, %s1609_s23 }
0x11ec   :  { %v701_v33 = vpop.permute.xlu0 %700 }
0x11ed   :  { %703 = vst.msk [vmem:[#allocation3] sm:$0xff] %vm403_vm4, %v701_v33 }
0x11ef   :  { %765 = vrot.lane.b32.xlu1 %v1812_v41, %s1609_s23  ;;  %v1393_v41 = vld [vmem:[#allocation7 + $0xd8] sm:$0xff] }
0x11f0   :  { %1018 = vmatpush.bf16.msrb.mxu3 %v1393_v41 }
0x11f4   :  { %v901_v38 = vld [vmem:[#allocation3] sm:$0xff]  ;;  %1019 = vmatpush.bf16.msrb.mxu3 %v1392_v42 }
0x11f8   :  { %1020 = vmatpush.bf16.msrb.mxu3 %v1391_v43 }
0x11fc   :  { %1021 = vmatpush.bf16.msrb.mxu3 %v1390_v45 }
0x1200   :  { %1022 = vmatpush.bf16.msrb.mxu3 %v1389_v1 }
0x1204   :  { %1023 = vmatpush.bf16.msrb.mxu3 %v1388_v48 }
0x1208   :  { %1024 = vmatpush.bf16.msrb.mxu3 %v1387_v49 }
0x120c   :  { %1025 = vmatpush.bf16.msrb.mxu3 %v1386_v51 }
0x1259   :  { %v886_v35 = vpop.permute.xlu1 %885 }
0x125a   :  { %v888_v36 = vadd.f32 %v886_v35, %v878_v16  ;;  %v1041_v35 = vlaneseq }
0x125c   :  { %1485 = vtanh.f32 %v888_v36 }
0x1261   :  { %v766_v44 = vpop.permute.xlu1 %765 }
0x1262   :  { %v1486_v37 = vpop.eup %1485  ;;  %769 = vst.msk [vmem:[#allocation3 + $0x8] sm:$0xff] %vm403_vm4, %v766_v44 }
0x1263   :  { %891 = vrot.lane.b32.xlu2 %v1486_v37, %s1605_s30 }
0x1269   :  { %v902_v39 = vld [vmem:[#allocation3 + $0x8] sm:$0xff] }
0x126a   :  { %v905_v40 = vpack.c.bf16 %v902_v39, %v901_v38  ;;  %v1042_v38 = vshrl.u32 %v1041_v35, 7 }
0x126b   :  { %831 = vrot.lane.b32.xlu2 %v828_v7, %s1609_s23 }
0x126c   :  { %1328 = vmatmul.msk.bf16.vlgmr.msra.gmra.mxu2 %vm403_vm4, %v905_v40  ;;  %v1043_v42 = vadd.s32 8, %v1042_v38 }
0x126e   :  { %v1057_v48 = vand.u32 7, %v1043_v42 }
0x1270   :  { %vm1866_vm3 = vcmp.lt.s32.totalorder %v1057_v48, 2 }
0x12bd   :  { %v892_v46 = vpop.permute.xlu2 %891 }
0x12be   :  { %v894_v47 = vmul.f32 %v892_v46, %v875_v12  ;;  %v1044_v46 = vadd.s32 16, %v1042_v38 }
0x12c0   :  { %896 = vrot.lane.b32.xlu0 %v894_v47, %s1609_s23 }
0x12c5   :  { %v832_v0 = vpop.permute.xlu2 %831 }
0x12c6   :  { %835 = vst.msk [vmem:[#allocation3 + $0x10] sm:$0xff] %vm403_vm4, %v832_v0  ;;  %v1050_v0 = vand.u32 7, %v1042_v38 }
0x12cd   :  { %v903_v58 = vld [vmem:[#allocation3 + $0x10] sm:$0xff] }
0x12ef   :  { %v940_v52 = vpop.f32.mrf.mxu2 }
0x12f0   :  { %v941_v8 = vadd.f32 %v1421_v53, %v940_v52 }
0x12f7   :  { %v942_v54 = vpop.f32.mrf.mxu2 }
0x12f8   :  { %v943_v55 = vadd.f32 %v1421_v53, %v942_v54  ;;  %v1064_v54 = vand.u32 7, %v1044_v46 }
0x12fa   :  { %v950_v56 = vpack.c.bf16 %v943_v55, %v941_v8  ;;  %v1045_v55 = vadd.s32 24, %v1042_v38  ;;  %vm1096_vm8 = vcmp.lt.s32.totalorder %v1064_v54, 2 }
0x12fc   :  { %1026 = vmatmul.bf16.vlgmr.msrb.gmra.mxu3 %v950_v56 }
0x1332   :  { %v897_v57 = vpop.permute.xlu0 %896 }
0x1333   :  { %900 = vst.msk [vmem:[#allocation3 + $0x18] sm:$0xff] %vm403_vm4, %v897_v57 }
0x133a   :  { %v904_v59 = vld [vmem:[#allocation3 + $0x18] sm:$0xff] }
0x133b   :  { %v906_v60 = vpack.c.bf16 %v904_v59, %v903_v58 }
0x133d   :  { %1329 = vmatmul.msk.bf16.gmra.mxu2 %vm403_vm4, %v906_v60  ;;  %vm1861_vm4 = vcmp.lt.s32.totalorder %v1050_v0, 2 }
0x137f   :  { %v1027_v62 = vpop.f32.mrf.mxu3 }
0x1380   :  { %v1028_v2 = vadd.f32 %v1422_v61, %v1027_v62  ;;  %v1611_v62 = vmov 8.0  }
0x1382   :  { %1037 = vst [vmem:[#allocation9] sm:$0xff] %v1028_v2  ;;  %v1110_v3 = vsub.f32 %v1028_v2, %v1106_v63 }
0x1384   :  { %v1114_v4 = vmul.f32 %v1110_v3, %v1110_v3 }
0x1386   :  { %1118 = vadd.xlane.f32.xlu1 %v1114_v4  ;;  %v1071_v4 = vand.u32 7, %v1045_v55 }
0x1387   :  { %v1029_v5 = vpop.f32.mrf.mxu3 }
0x1388   :  { %v1030_v7 = vadd.f32 %v1422_v61, %v1029_v5  ;;  %vm1097_vm11 = vcmp.lt.s32.totalorder %v1071_v4, 2 }
0x138a   :  { %1038 = vst [vmem:[#allocation9 + $0x8] sm:$0xff] %v1030_v7  ;;  %v1111_v9 = vsub.f32 %v1030_v7, %v1107_v6  ;;  %v1612_v7 = vmov 0.0  }
0x138c   :  { %v1115_v10 = vmul.f32 %v1111_v9, %v1111_v9  ;;  %v1363_v9 = vsel %vm1866_vm3, 1.0, %v1612_v7 }
0x138e   :  { %1120 = vadd.xlane.f32.xlu2 %v1115_v10 }
0x13c0   :  { %v945_v11 = vpop.f32.mrf.mxu2 }
0x13c1   :  { %v946_v24 = vadd.f32 %v1421_v53, %v945_v11 }
0x13c8   :  { %v947_v19 = vpop.f32.mrf.mxu2 }
0x13c9   :  { %v948_v13 = vadd.f32 %v1421_v53, %v947_v19 }
0x13cb   :  { %v951_v23 = vpack.c.bf16 %v948_v13, %v946_v24  ;;  %v1362_v24 = vsel %vm1861_vm4, 1.0, %v1612_v7 }
0x13cd   :  { %1031 = vmatmul.bf16.gmra.mxu3 %v951_v23  ;;  %v1364_v23 = vsel %vm1096_vm8, 1.0, %v1612_v7 }
0x13f9   :  { %v1852_v29 = vpop.xlane.xlu1 %1118 }
0x13fa   :  { %vm1133_vm2 = vcmp.eq.f32.partialorder %v1852_v29, inf  ;;  %v1136_v6 = vand.u32 2147483648, %v1852_v29  ;;  %vm1135_vm9 = vcmp.eq.f32.partialorder %v1852_v29, 0.0 }
0x1401   :  { %v1121_v28 = vpop.xlane.xlu2 %1120 }
0x1402   :  { %1487 = vrsqrt.f32 %v1121_v28  ;;  %vm1145_vm5 = vcmp.eq.f32.partialorder %v1121_v28, inf  ;;  %vm1147_vm6 = vcmp.eq.f32.partialorder %v1121_v28, 0.0  ;;  %v1148_v2 = vand.u32 2147483648, %v1121_v28 }
0x1403   :  { %1489 = vrsqrt.f32 %v1852_v29 }
0x1408   :  { %v1488_v30 = vpop.eup %1487 }
0x1409   :  { %v1490_v31 = vpop.eup %1489  ;;  %v1139_v12 = vmul.f32 %v1488_v30, %v1121_v28 }
0x140a   :  { %v1127_v32 = vmul.f32 %v1490_v31, %v1852_v29 }
0x140b   :  { %v1140_v33 = vmul.f32 %v1488_v30, %v1139_v12 }
0x140c   :  { %v1128_v14 = vmul.f32 %v1490_v31, %v1127_v32 }
0x140d   :  { %v1141_v16 = vmul.f32 0.5, %v1140_v33 }
0x140e   :  { %v1129_v36 = vmul.f32 0.5, %v1128_v14 }
0x140f   :  { %v1142_v44 = vsub.f32 1.5, %v1141_v16 }
0x1410   :  { %v1130_v39 = vsub.f32 1.5, %v1129_v36 }
0x1411   :  { %v1143_v43 = vmul.f32 %v1488_v30, %v1142_v44 }
0x1412   :  { %v1131_v1 = vmul.f32 %v1490_v31, %v1130_v39 }
0x1413   :  { %v1144_v49 = vmul.f32 %v1143_v43, %v1121_v28 }
0x1414   :  { %v1132_v53 = vmul.f32 %v1131_v1, %v1852_v29 }
0x1415   :  { %v1146_v59 = vsel %vm1145_vm5, %v1121_v28, %v1144_v49 }
0x1416   :  { %v1134_v63 = vsel %vm1133_vm2, %v1852_v29, %v1132_v53  ;;  %v1149_v10 = vsel %vm1147_vm6, %v1148_v2, %v1146_v59 }
0x1417   :  { %v1137_v13 = vsel %vm1135_vm9, %v1136_v6, %v1134_v63 }
0x1450   :  { %v1032_v15 = vpop.f32.mrf.mxu3 }
0x1451   :  { %v1033_v18 = vadd.f32 %v1422_v61, %v1032_v15 }
0x1453   :  { %1039 = vst [vmem:[#allocation9 + $0x10] sm:$0xff] %v1033_v18  ;;  %v1112_v20 = vsub.f32 %v1033_v18, %v1108_v17  ;;  %v1175_v18 = vmul.f32 %v1363_v9, %v1149_v10 }
0x1455   :  { %v1116_v21 = vmul.f32 %v1112_v20, %v1112_v20 }
0x1457   :  { %1122 = vadd.xlane.f32.xlu0 %v1116_v21  ;;  %v1174_v21 = vmul.f32 %v1362_v24, %v1137_v13 }
0x1458   :  { %v1034_v22 = vpop.f32.mrf.mxu3 }
0x1459   :  { %v1035_v26 = vadd.f32 %v1422_v61, %v1034_v22  ;;  %v1178_v28 = vadd.f32 %v1175_v18, %v1174_v21 }
0x145b   :  { %1040 = vst [vmem:[#allocation9 + $0x18] sm:$0xff] %v1035_v26  ;;  %v1113_v50 = vsub.f32 %v1035_v26, %v1109_v25  ;;  %v1365_v26 = vsel %vm1097_vm11, 1.0, %v1612_v7 }
0x145c   :  { %1209 = dma.vmem_to_hbm [thread:$0]  %s1202_s13, 512, %s1204_s11, [#allocation6], %s1602_s26, %s1602_s26, %s1603_s27  }
0x145d   :  { %v1117_v27 = vmul.f32 %v1113_v50, %v1113_v50  ;;  %s1215_s26 = sshll.u32 %s1613_s4, 4  ;;  %s1216_s26 = int_to_ptr.vmem [resolvable:$true] %s1215_s26 }
0x145f   :  { %1124 = vadd.xlane.f32.xlu2 %v1117_v27 }
0x14ca   :  { %v1123_v34 = vpop.xlane.xlu0 %1122 }
0x14cb   :  { %1491 = vrsqrt.f32 %v1123_v34  ;;  %vm1157_vm7 = vcmp.eq.f32.partialorder %v1123_v34, inf  ;;  %v1160_v11 = vand.u32 2147483648, %v1123_v34  ;;  %vm1159_vm10 = vcmp.eq.f32.partialorder %v1123_v34, 0.0 }
0x14d1   :  { %v1492_v37 = vpop.eup %1491 }
0x14d2   :  { %v1151_v40 = vmul.f32 %v1492_v37, %v1123_v34  ;;  %v1856_v41 = vpop.xlane.xlu2 %1124 }
0x14d3   :  { %1493 = vrsqrt.f32 %v1856_v41  ;;  %vm1169_vm12 = vcmp.eq.f32.partialorder %v1856_v41, inf  ;;  %v1172_v50 = vand.u32 2147483648, %v1856_v41  ;;  %vm1171_vm13 = vcmp.eq.f32.partialorder %v1856_v41, 0.0 }
0x14d4   :  { %v1152_v45 = vmul.f32 %v1492_v37, %v1151_v40  ;;  %1495 = vrcp.f32 %v1611_v62 }
0x14d6   :  { %v1153_v47 = vmul.f32 0.5, %v1152_v45 }
0x14d8   :  { %v1154_v51 = vsub.f32 1.5, %v1153_v47 }
0x14d9   :  { %v1494_v52 = vpop.eup %1493 }
0x14da   :  { %v1155_v8 = vmul.f32 %v1492_v37, %v1154_v51  ;;  %v1163_v56 = vmul.f32 %v1494_v52, %v1856_v41  ;;  %v1496_v17 = vpop.eup %1495 }
0x14db   :  { %v1188_v27 = vmul.f32 8.0, %v1496_v17  ;;  %vm1192_vm14 = vweird.f32 %v1496_v17 }
0x14dc   :  { %v1156_v60 = vmul.f32 %v1155_v8, %v1123_v34  ;;  %v1164_v61 = vmul.f32 %v1494_v52, %v1163_v56 }
0x14dd   :  { %v1189_v32 = vsub.f32 1.0, %v1188_v27 }
0x14de   :  { %v1158_v3 = vsel %vm1157_vm7, %v1123_v34, %v1156_v60  ;;  %v1165_v5 = vmul.f32 0.5, %v1164_v61 }
0x14df   :  { %v1161_v15 = vsel %vm1159_vm10, %v1160_v11, %v1158_v3  ;;  %v1190_v34 = vmul.f32 %v1496_v17, %v1189_v32 }
0x14e0   :  { %v1166_v19 = vsub.f32 1.5, %v1165_v5  ;;  %v1176_v22 = vmul.f32 %v1364_v23, %v1161_v15 }
0x14e1   :  { %v1191_v36 = vadd.f32 %v1496_v17, %v1190_v34 }
0x14e2   :  { %v1167_v20 = vmul.f32 %v1494_v52, %v1166_v19  ;;  %v1179_v31 = vadd.f32 %v1178_v28, %v1176_v22 }
0x14e3   :  { %v1193_v38 = vsel %vm1192_vm14, %v1496_v17, %v1191_v36 }
0x14e4   :  { %v1168_v25 = vmul.f32 %v1167_v20, %v1856_v41 }
0x14e6   :  { %v1170_v29 = vsel %vm1169_vm12, %v1856_v41, %v1168_v25 }
0x14e7   :  { %v1173_v30 = vsel %vm1171_vm13, %v1172_v50, %v1170_v29 }
0x14e8   :  { %v1177_v12 = vmul.f32 %v1365_v26, %v1173_v30 }
0x14ea   :  { %v1180_v33 = vadd.f32 %v1179_v31, %v1177_v12 }
0x14ec   :  { %v1181_v14 = vrot.slane %v1180_v33, 4 }
0x14ee   :  { %v1182_v16 = vadd.f32 %v1181_v14, %v1180_v33 }
0x14f0   :  { %v1183_v35 = vrot.slane %v1182_v16, 2 }
0x14f2   :  { %v1184_v44 = vadd.f32 %v1183_v35, %v1182_v16 }
0x14f4   :  { %v1185_v37 = vrot.slane %v1184_v44, 1 }
0x14f6   :  { %v1186_v39 = vadd.f32 %v1185_v37, %v1184_v44 }
0x14f8   :  { %v1194_v40 = vmul.f32 %v1193_v38, %v1186_v39 }
0x14fa   :  { %1196 = vst.msk [vmem:[#allocation10] sm:$0x1] %vm1195_vm15, %v1194_v40 }
0x14fb   :  { %1220 = dma.vmem_to_hbm [thread:$0]  %s1216_s26, 16, %s1218_s15, [#allocation11]  }
0x14fc   :  { %1597 = dma.done.wait [#allocation6], 512  }
0x14fd   :  { %1598 = vsyncadd [#allocation6], 4294966784 }
0x14fe   :  { %1599 = dma.done.wait [#allocation11], 16  }
0x14ff   :  { %1600 = vsyncadd [#allocation11], 4294967280 }
0x1500   :  { %1229 = vsyncpa [#allocation5], 1 }
0x1501   :  { %1230 = vsyncpa [#allocation8], 1 }
0x1502   :  { %1231 = vsyncpa [#allocation6], 1 }
0x1503   :  { %1232 = vsyncpa [#allocation11], 1 }

</bundles_post_ra>
